<compile_context>
chip_gen: v5e
topology: v5e:2x2
jax: 0.10.0
libtpu: 0.0.40
codegen_flags: <defaults>
</compile_context>

<pallas_src>
import math
import functools

import jax
import jax.numpy as jnp
from jax.experimental import pallas as pl
from jax.experimental.pallas import tpu as pltpu

# ---------------- configuration (small, consistent with the module) ----------
B = 2            # batch
SX = 8           # decoder sequence length
SM = 16          # memory (encoder) sequence length
D_MODEL = 32
SELF_HEADS = 4
CROSS_HEADS = 8
FF = 64
EPS = 1e-6
NEG_INF = -1.0e9

NX = B * SX      # flattened decoder tokens
NM = B * SM      # flattened memory tokens


# ------------------------------ Pallas kernel --------------------------------
def dec_layer_kernel(
    x_ref, mem_ref, self_bias_ref, cross_bias_ref,
    sa_wqkv_ref, sa_bqkv_ref, sa_woh_ref,
    ca_wq_ref, ca_wkv_ref, ca_bkv_ref, ca_woh_ref,
    ff_w1_ref, ff_b1_ref, ff_w2_ref,
    vec_ref,
    o_ref,
):
    D = D_MODEL
    x = x_ref[...]          # (NX, D)  batch folded into the token axis
    mem = mem_ref[...]      # (NM, D)
    vec = vec_ref[...]      # (10, D): ln a1,b1,a2,b2,a3,b3, sa_bo, ca_bq, ca_bo, ff_b2

    def row(i):             # (1, D) row of the packed small-vector blob
        return vec[i:i + 1, :]

    def layernorm(t, a_row, b_row):
        mean = jnp.mean(t, axis=-1, keepdims=True)
        c = t - mean
        # PyTorch .std() is unbiased (ddof=1); eps is added to std.
        var = jnp.sum(c * c, axis=-1, keepdims=True) * (1.0 / (D - 1))
        std = jnp.sqrt(var)
        return row(a_row) * c / (std + EPS) + row(b_row)

    def attention(q, k, v, bias, heads, wo_h, bo):
        # q: (Nq, D); k, v: (Nk, D); bias: (Nq, Nk) additive mask (-1e9 on
        # masked keys and cross-batch entries); wo_h: (heads, dk, D); bo: (1, D)
        dk = D // heads
        scale = 1.0 / math.sqrt(dk)
        # Head split: static lane slices stacked on a new (major) batch axis.
        # All per-head work then runs as head-batched einsums (no Python loop
        # over matmul results, no lane-direction concatenate).
        q_h = jnp.stack([q[:, h * dk:(h + 1) * dk] for h in range(heads)], axis=0)
        k_h = jnp.stack([k[:, h * dk:(h + 1) * dk] for h in range(heads)], axis=0)
        v_h = jnp.stack([v[:, h * dk:(h + 1) * dk] for h in range(heads)], axis=0)
        s = jnp.einsum('hqd,hkd->hqk', q_h, k_h,
                       preferred_element_type=jnp.float32)
        s = s * scale + bias[None, :, :]                     # one vadd, no where()
        m = jnp.max(s, axis=-1, keepdims=True)
        e = jnp.exp(s - m)
        p = e / jnp.sum(e, axis=-1, keepdims=True)           # exact (tolerance-safe)
        o_h = jnp.einsum('hqk,hkd->hqd', p, v_h,
                         preferred_element_type=jnp.float32)  # (H, Nq, dk)
        # concat_h(o_h) @ Wo  ==  sum_h o_h @ Wo[h*dk:(h+1)*dk, :]
        out = jnp.einsum('hqd,hdo->hqo', o_h, wo_h,
                         preferred_element_type=jnp.float32)  # (H, Nq, D)
        return jnp.sum(out, axis=0) + bo

    # 1) self attention (the reference module routes memory_mask here)
    qkv = jnp.dot(x, sa_wqkv_ref[...],
                  preferred_element_type=jnp.float32) + sa_bqkv_ref[...]
    sa = attention(qkv[:, 0:D], qkv[:, D:2 * D], qkv[:, 2 * D:3 * D],
                   self_bias_ref[...], SELF_HEADS, sa_woh_ref[...], row(6))
    x1 = layernorm(x + sa, 0, 1)

    # 2) cross attention (the reference module routes x_mask here)
    q_c = jnp.dot(x1, ca_wq_ref[...],
                  preferred_element_type=jnp.float32) + row(7)
    kv = jnp.dot(mem, ca_wkv_ref[...],
                 preferred_element_type=jnp.float32) + ca_bkv_ref[...]
    ca = attention(q_c, kv[:, 0:D], kv[:, D:2 * D],
                   cross_bias_ref[...], CROSS_HEADS, ca_woh_ref[...], row(8))
    x2 = layernorm(x1 + ca, 2, 3)

    # 3) position-wise feed forward (dropouts are identity in eval mode)
    h = jnp.maximum(
        jnp.dot(x2, ff_w1_ref[...], preferred_element_type=jnp.float32)
        + ff_b1_ref[...], 0.0)
    ffo = jnp.dot(h, ff_w2_ref[...], preferred_element_type=jnp.float32) + row(9)
    x3 = layernorm(x2 + ffo, 4, 5)

    o_ref[...] = x3


# --------------------------- wrapper / param packing --------------------------
def _mask_to_bias(key_mask, n_q):
    """key_mask (B, 1, Sk) of 0/1  ->  additive bias (B*n_q, B*Sk):
    0 where (same batch AND key unmasked), -1e9 otherwise (masked key or
    cross-batch entry of the folded token axis)."""
    Bq, _, Sk = key_mask.shape
    same = jnp.eye(Bq, dtype=bool)                                   # (B, B)
    keep = same[:, None, :, None] & (key_mask[:, 0, :] != 0.0)[None, None, :, :]
    keep = jnp.broadcast_to(keep, (Bq, n_q, Bq, Sk))
    bias = jnp.where(keep, 0.0, NEG_INF).astype(jnp.float32)
    return bias.reshape(Bq * n_q, Bq * Sk)


def pack_params(params):
    (sa_p, ca_p, n1_a, n1_b, n2_a, n2_b, n3_a, n3_b,
     ff_w1, ff_b1, ff_w2, ff_b2) = params
    sa_wq, sa_bq, sa_wk, sa_bk, sa_wv, sa_bv, sa_wo, sa_bo = sa_p
    ca_wq, ca_bq, ca_wk, ca_bk, ca_wv, ca_bv, ca_wo, ca_bo = ca_p
    dk_s = D_MODEL // SELF_HEADS
    dk_c = D_MODEL // CROSS_HEADS

    sa_wqkv = jnp.concatenate([sa_wq, sa_wk, sa_wv], axis=1)          # (D, 3D)
    sa_bqkv = jnp.concatenate([sa_bq, sa_bk, sa_bv], axis=1)          # (1, 3D)
    sa_woh = sa_wo.reshape(SELF_HEADS, dk_s, D_MODEL)                 # (H, dk, D)
    ca_wkv = jnp.concatenate([ca_wk, ca_wv], axis=1)                  # (D, 2D)
    ca_bkv = jnp.concatenate([ca_bk, ca_bv], axis=1)                  # (1, 2D)
    ca_woh = ca_wo.reshape(CROSS_HEADS, dk_c, D_MODEL)                # (H, dk, D)
    # small (1, D) vectors packed into one (10, D) blob, sliced in-kernel
    vec = jnp.concatenate([n1_a, n1_b, n2_a, n2_b, n3_a, n3_b,
                           sa_bo, ca_bq, ca_bo, ff_b2], axis=0)        # (10, D)
    return (sa_wqkv, sa_bqkv, sa_woh,
            ca_wq, ca_wkv, ca_bkv, ca_woh,
            ff_w1, ff_b1, ff_w2, vec)


@functools.partial(jax.jit)
def transformer_dec_layer(x, memory, x_mask, memory_mask, params):
    B_, Sx, D = x.shape
    Sm = memory.shape[1]

    x2d = x.reshape(B_ * Sx, D)            # free reshapes done in HBM / wrapper
    mem2d = memory.reshape(B_ * Sm, D)
    self_bias = _mask_to_bias(memory_mask, Sx)   # (B*Sx, B*Sx): self keys are x
    cross_bias = _mask_to_bias(x_mask, Sx)       # (B*Sx, B*Sm): cross keys are memory

    args = (x2d, mem2d, self_bias, cross_bias) + pack_params(params)

    vmem = pl.BlockSpec(memory_space=pltpu.MemorySpace.VMEM)   # whole array in VMEM
    out2d = pl.pallas_call(
        dec_layer_kernel,
        out_shape=jax.ShapeDtypeStruct((B_ * Sx, D), jnp.float32),
        in_specs=[vmem] * len(args),
        out_specs=vmem,
    )(*args)
    return out2d.reshape(B_, Sx, D)


# --------------------------- pure-JAX reference -------------------------------
def ref_layernorm(x, a, b):
    mean = x.mean(-1, keepdims=True)
    c = x - mean
    std = jnp.sqrt(jnp.sum(c * c, -1, keepdims=True) / (x.shape[-1] - 1))
    return a * c / (std + EPS) + b


def ref_mha(q, k, v, mask, p, heads):
    wq, bq, wk, bk, wv, bv, wo, bo = p
    Bq, Sq, D = q.shape
    Sk = k.shape[1]
    dk = D // heads
    qp = (q @ wq + bq).reshape(Bq, Sq, heads, dk).transpose(0, 2, 1, 3)
    kp = (k @ wk + bk).reshape(Bq, Sk, heads, dk).transpose(0, 2, 1, 3)
    vp = (v @ wv + bv).reshape(Bq, Sk, heads, dk).transpose(0, 2, 1, 3)
    s = jnp.einsum('bhqd,bhkd->bhqk', qp, kp) / math.sqrt(dk)
    s = jnp.where(mask[:, None, :, :] == 0.0, NEG_INF, s)
    pr = jax.nn.softmax(s, axis=-1)
    o = jnp.einsum('bhqk,bhkd->bhqd', pr, vp)
    o = o.transpose(0, 2, 1, 3).reshape(Bq, Sq, D)
    return o @ wo + bo


def ref_forward(x, memory, x_mask, memory_mask, params):
    (sa_p, ca_p, n1_a, n1_b, n2_a, n2_b, n3_a, n3_b,
     ff_w1, ff_b1, ff_w2, ff_b2) = params
    x1 = ref_layernorm(x + ref_mha(x, x, x, memory_mask, sa_p, SELF_HEADS),
                       n1_a, n1_b)
    x2 = ref_layernorm(
        x1 + ref_mha(x1, memory, memory, x_mask, ca_p, CROSS_HEADS),
        n2_a, n2_b)
    h = jnp.maximum(x2 @ ff_w1 + ff_b1, 0.0)
    x3 = ref_layernorm(x2 + (h @ ff_w2 + ff_b2), n3_a, n3_b)
    return x3


# ------------------------------ parameter init --------------------------------
def make_params(key):
    keys = jax.random.split(key, 32)
    it = iter(range(32))

    def nrm(shape, scale=0.1):
        return (scale * jax.random.normal(keys[next(it)], shape)).astype(jnp.float32)

    def attn_params():
        return (
            nrm((D_MODEL, D_MODEL)), nrm((1, D_MODEL)),   # Wq (in,out), bq
            nrm((D_MODEL, D_MODEL)), nrm((1, D_MODEL)),   # Wk, bk
            nrm((D_MODEL, D_MODEL)), nrm((1, D_MODEL)),   # Wv, bv
            nrm((D_MODEL, D_MODEL)), nrm((1, D_MODEL)),   # Wo, bo
        )

    sa_p = attn_params()
    ca_p = attn_params()
    n1_a = jnp.ones((1, D_MODEL), jnp.float32); n1_b = jnp.zeros((1, D_MODEL), jnp.float32)
    n2_a = jnp.ones((1, D_MODEL), jnp.float32); n2_b = jnp.zeros((1, D_MODEL), jnp.float32)
    n3_a = jnp.ones((1, D_MODEL), jnp.float32); n3_b = jnp.zeros((1, D_MODEL), jnp.float32)
    ff_w1 = nrm((D_MODEL, FF)); ff_b1 = nrm((1, FF))
    ff_w2 = nrm((FF, D_MODEL)); ff_b2 = nrm((1, D_MODEL))
    return (sa_p, ca_p, n1_a, n1_b, n2_a, n2_b, n3_a, n3_b,
            ff_w1, ff_b1, ff_w2, ff_b2)


# ------------------------------------ main ------------------------------------
if __name__ == "__main__":
    key = jax.random.PRNGKey(0)
    k_x, k_mem, k_xm, k_mm, k_p = jax.random.split(key, 5)

    x = jax.random.normal(k_x, (B, SX, D_MODEL), dtype=jnp.float32)
    memory = jax.random.normal(k_mem, (B, SM, D_MODEL), dtype=jnp.float32)

    # x_mask masks the MEMORY keys in cross-attn; memory_mask masks X keys in
    # self-attn (this mirrors the argument usage in the PyTorch forward).
    x_mask = jax.random.bernoulli(k_xm, 0.8, (B, 1, SM)).astype(jnp.float32)
    memory_mask = jax.random.bernoulli(k_mm, 0.8, (B, 1, SX)).astype(jnp.float32)
    x_mask = x_mask.at[..., 0].set(1.0)
    memory_mask = memory_mask.at[..., 0].set(1.0)

    params = make_params(k_p)

    out = transformer_dec_layer(x, memory, x_mask, memory_mask, params)
    out = jax.block_until_ready(out)

    ref = jax.block_until_ready(ref_forward(x, memory, x_mask, memory_mask, params))
    assert out.shape == (B, SX, D_MODEL)
    assert jnp.allclose(out, ref, rtol=1e-4, atol=1e-4), (
        f"max abs err {jnp.max(jnp.abs(out - ref))}")

    print("KERNEL_OK")
</pallas_src>

<mosaic_0001>
module attributes {stable_mosaic.version = 11 : i64} {
  func.func @dec_layer_kernel(%arg0: memref<16x32xf32, #tpu.memory_space<vmem>>, %arg1: memref<32x32xf32, #tpu.memory_space<vmem>>, %arg2: memref<16x16xf32, #tpu.memory_space<vmem>>, %arg3: memref<16x32xf32, #tpu.memory_space<vmem>>, %arg4: memref<32x96xf32, #tpu.memory_space<vmem>>, %arg5: memref<1x96xf32, #tpu.memory_space<vmem>>, %arg6: memref<4x8x32xf32, #tpu.memory_space<vmem>>, %arg7: memref<32x32xf32, #tpu.memory_space<vmem>>, %arg8: memref<32x64xf32, #tpu.memory_space<vmem>>, %arg9: memref<1x64xf32, #tpu.memory_space<vmem>>, %arg10: memref<8x4x32xf32, #tpu.memory_space<vmem>>, %arg11: memref<32x64xf32, #tpu.memory_space<vmem>>, %arg12: memref<1x64xf32, #tpu.memory_space<vmem>>, %arg13: memref<64x32xf32, #tpu.memory_space<vmem>>, %arg14: memref<10x32xf32, #tpu.memory_space<vmem>>, %arg15: memref<16x32xf32, #tpu.memory_space<vmem>>) attributes {dimension_semantics = [], scalar_prefetch = 0 : i64, scratch_operands = 0 : i64, tpu.core_type = #tpu.core_type<tc>} {
    %c0 = arith.constant 0 : index
    %c0_0 = arith.constant 0 : index
    %0 = vector.load %arg0[%c0, %c0_0] : memref<16x32xf32, #tpu.memory_space<vmem>>, vector<16x32xf32>
    %c0_1 = arith.constant 0 : index
    %c0_2 = arith.constant 0 : index
    %1 = vector.load %arg1[%c0_1, %c0_2] : memref<32x32xf32, #tpu.memory_space<vmem>>, vector<32x32xf32>
    %c0_3 = arith.constant 0 : index
    %c0_4 = arith.constant 0 : index
    %2 = vector.load %arg14[%c0_3, %c0_4] : memref<10x32xf32, #tpu.memory_space<vmem>>, vector<10x32xf32>
    %c0_5 = arith.constant 0 : index
    %c0_6 = arith.constant 0 : index
    %3 = vector.load %arg4[%c0_5, %c0_6] : memref<32x96xf32, #tpu.memory_space<vmem>>, vector<32x96xf32>
    %cst = arith.constant dense<0.000000e+00> : vector<16x96xf32>
    %4 = tpu.matmul %0, %3, %cst {dimension_numbers = #tpu.dot_dimension_numbers<[1], [0], [0], [1], [0, 0, 1, 1], [], []>} : vector<16x32xf32>, vector<32x96xf32>, vector<16x96xf32> -> vector<16x96xf32>
    %c0_7 = arith.constant 0 : index
    %c0_8 = arith.constant 0 : index
    %5 = vector.load %arg5[%c0_7, %c0_8] : memref<1x96xf32, #tpu.memory_space<vmem>>, vector<1x96xf32>
    %6 = vector.broadcast %5 : vector<1x96xf32> to vector<16x96xf32>
    %7 = arith.addf %4, %6 : vector<16x96xf32>
    %8 = vector.extract_strided_slice %7 {offsets = [0, 0], sizes = [16, 32], strides = [1, 1]} : vector<16x96xf32> to vector<16x32xf32>
    %9 = vector.extract_strided_slice %7 {offsets = [0, 32], sizes = [16, 32], strides = [1, 1]} : vector<16x96xf32> to vector<16x32xf32>
    %10 = vector.extract_strided_slice %7 {offsets = [0, 64], sizes = [16, 32], strides = [1, 1]} : vector<16x96xf32> to vector<16x32xf32>
    %c0_9 = arith.constant 0 : index
    %c0_10 = arith.constant 0 : index
    %11 = vector.load %arg2[%c0_9, %c0_10] : memref<16x16xf32, #tpu.memory_space<vmem>>, vector<16x16xf32>
    %c0_11 = arith.constant 0 : index
    %c0_12 = arith.constant 0 : index
    %c0_13 = arith.constant 0 : index
    %12 = vector.load %arg6[%c0_11, %c0_12, %c0_13] : memref<4x8x32xf32, #tpu.memory_space<vmem>>, vector<4x8x32xf32>
    %13 = vector.extract_strided_slice %2 {offsets = [6, 0], sizes = [1, 32], strides = [1, 1]} : vector<10x32xf32> to vector<1x32xf32>
    %14 = vector.extract_strided_slice %8 {offsets = [0, 0], sizes = [16, 8], strides = [1, 1]} : vector<16x32xf32> to vector<16x8xf32>
    %15 = vector.extract_strided_slice %8 {offsets = [0, 8], sizes = [16, 8], strides = [1, 1]} : vector<16x32xf32> to vector<16x8xf32>
    %16 = vector.extract_strided_slice %8 {offsets = [0, 16], sizes = [16, 8], strides = [1, 1]} : vector<16x32xf32> to vector<16x8xf32>
    %17 = vector.extract_strided_slice %8 {offsets = [0, 24], sizes = [16, 8], strides = [1, 1]} : vector<16x32xf32> to vector<16x8xf32>
    %18 = vector.shape_cast %14 : vector<16x8xf32> to vector<1x16x8xf32>
    %19 = vector.shape_cast %15 : vector<16x8xf32> to vector<1x16x8xf32>
    %20 = vector.shape_cast %16 : vector<16x8xf32> to vector<1x16x8xf32>
    %21 = vector.shape_cast %17 : vector<16x8xf32> to vector<1x16x8xf32>
    %22 = tpu.concatenate %18, %19, %20, %21 in 0 : vector<1x16x8xf32>, vector<1x16x8xf32>, vector<1x16x8xf32>, vector<1x16x8xf32> -> vector<4x16x8xf32>
    %23 = vector.extract_strided_slice %9 {offsets = [0, 0], sizes = [16, 8], strides = [1, 1]} : vector<16x32xf32> to vector<16x8xf32>
    %24 = vector.extract_strided_slice %9 {offsets = [0, 8], sizes = [16, 8], strides = [1, 1]} : vector<16x32xf32> to vector<16x8xf32>
    %25 = vector.extract_strided_slice %9 {offsets = [0, 16], sizes = [16, 8], strides = [1, 1]} : vector<16x32xf32> to vector<16x8xf32>
    %26 = vector.extract_strided_slice %9 {offsets = [0, 24], sizes = [16, 8], strides = [1, 1]} : vector<16x32xf32> to vector<16x8xf32>
    %27 = vector.shape_cast %23 : vector<16x8xf32> to vector<1x16x8xf32>
    %28 = vector.shape_cast %24 : vector<16x8xf32> to vector<1x16x8xf32>
    %29 = vector.shape_cast %25 : vector<16x8xf32> to vector<1x16x8xf32>
    %30 = vector.shape_cast %26 : vector<16x8xf32> to vector<1x16x8xf32>
    %31 = tpu.concatenate %27, %28, %29, %30 in 0 : vector<1x16x8xf32>, vector<1x16x8xf32>, vector<1x16x8xf32>, vector<1x16x8xf32> -> vector<4x16x8xf32>
    %32 = vector.extract_strided_slice %10 {offsets = [0, 0], sizes = [16, 8], strides = [1, 1]} : vector<16x32xf32> to vector<16x8xf32>
    %33 = vector.extract_strided_slice %10 {offsets = [0, 8], sizes = [16, 8], strides = [1, 1]} : vector<16x32xf32> to vector<16x8xf32>
    %34 = vector.extract_strided_slice %10 {offsets = [0, 16], sizes = [16, 8], strides = [1, 1]} : vector<16x32xf32> to vector<16x8xf32>
    %35 = vector.extract_strided_slice %10 {offsets = [0, 24], sizes = [16, 8], strides = [1, 1]} : vector<16x32xf32> to vector<16x8xf32>
    %36 = vector.shape_cast %32 : vector<16x8xf32> to vector<1x16x8xf32>
    %37 = vector.shape_cast %33 : vector<16x8xf32> to vector<1x16x8xf32>
    %38 = vector.shape_cast %34 : vector<16x8xf32> to vector<1x16x8xf32>
    %39 = vector.shape_cast %35 : vector<16x8xf32> to vector<1x16x8xf32>
    %40 = tpu.concatenate %36, %37, %38, %39 in 0 : vector<1x16x8xf32>, vector<1x16x8xf32>, vector<1x16x8xf32>, vector<1x16x8xf32> -> vector<4x16x8xf32>
    "tpu.trace_start"() <{level = 10 : i32, message = "hqd,hkd->hqk"}> : () -> ()
    %cst_14 = arith.constant dense<0.000000e+00> : vector<4x16x16xf32>
    %41 = tpu.matmul %22, %31, %cst_14 {dimension_numbers = #tpu.dot_dimension_numbers<[2], [2], [1], [1], [0, 0, 0, 1, 1, 1], [0], [0]>} : vector<4x16x8xf32>, vector<4x16x8xf32>, vector<4x16x16xf32> -> vector<4x16x16xf32>
    "tpu.trace_stop"() : () -> ()
    %cst_15 = arith.constant 0.353553385 : f32
    %42 = vector.broadcast %cst_15 : f32 to vector<4x16x16xf32>
    %43 = arith.mulf %41, %42 : vector<4x16x16xf32>
    %44 = vector.shape_cast %11 : vector<16x16xf32> to vector<1x16x16xf32>
    %45 = vector.broadcast %44 : vector<1x16x16xf32> to vector<4x16x16xf32>
    %46 = arith.addf %43, %45 : vector<4x16x16xf32>
    %cst_16 = arith.constant dense<0xFF800000> : vector<4x16xf32>
    %47 = vector.multi_reduction <maximumf>, %46, %cst_16 [2] : vector<4x16x16xf32> to vector<4x16xf32>
    %48 = vector.shape_cast %47 : vector<4x16xf32> to vector<4x16x1xf32>
    %49 = vector.broadcast %48 : vector<4x16x1xf32> to vector<4x16x16xf32>
    %50 = arith.subf %46, %49 : vector<4x16x16xf32>
    %51 = math.exp %50 : vector<4x16x16xf32>
    %cst_17 = arith.constant dense<0.000000e+00> : vector<4x16xf32>
    %52 = vector.multi_reduction <add>, %51, %cst_17 [2] : vector<4x16x16xf32> to vector<4x16xf32>
    %53 = vector.shape_cast %52 : vector<4x16xf32> to vector<4x16x1xf32>
    %54 = vector.broadcast %53 : vector<4x16x1xf32> to vector<4x16x16xf32>
    %55 = arith.divf %51, %54 : vector<4x16x16xf32>
    "tpu.trace_start"() <{level = 10 : i32, message = "hqk,hkd->hqd"}> : () -> ()
    %cst_18 = arith.constant dense<0.000000e+00> : vector<4x16x8xf32>
    %56 = tpu.matmul %55, %40, %cst_18 {dimension_numbers = #tpu.dot_dimension_numbers<[2], [1], [1], [2], [0, 0, 0, 1, 1, 2], [0], [0]>} : vector<4x16x16xf32>, vector<4x16x8xf32>, vector<4x16x8xf32> -> vector<4x16x8xf32>
    "tpu.trace_stop"() : () -> ()
    "tpu.trace_start"() <{level = 10 : i32, message = "hqd,hdo->hqo"}> : () -> ()
    %cst_19 = arith.constant dense<0.000000e+00> : vector<4x16x32xf32>
    %57 = tpu.matmul %56, %12, %cst_19 {dimension_numbers = #tpu.dot_dimension_numbers<[2], [1], [1], [2], [0, 0, 0, 1, 1, 2], [0], [0]>} : vector<4x16x8xf32>, vector<4x8x32xf32>, vector<4x16x32xf32> -> vector<4x16x32xf32>
    "tpu.trace_stop"() : () -> ()
    %cst_20 = arith.constant dense<0.000000e+00> : vector<16x32xf32>
    %58 = vector.multi_reduction <add>, %57, %cst_20 [0] : vector<4x16x32xf32> to vector<16x32xf32>
    %59 = vector.broadcast %13 : vector<1x32xf32> to vector<16x32xf32>
    %60 = arith.addf %58, %59 : vector<16x32xf32>
    %61 = arith.addf %0, %60 : vector<16x32xf32>
    %cst_21 = arith.constant dense<0.000000e+00> : vector<16xf32>
    %62 = vector.multi_reduction <add>, %61, %cst_21 [1] : vector<16x32xf32> to vector<16xf32>
    %63 = vector.shape_cast %62 : vector<16xf32> to vector<16x1xf32>
    %cst_22 = arith.constant 3.200000e+01 : f32
    %64 = vector.broadcast %cst_22 : f32 to vector<16x1xf32>
    %65 = arith.divf %63, %64 : vector<16x1xf32>
    %66 = vector.broadcast %65 : vector<16x1xf32> to vector<16x32xf32>
    %67 = arith.subf %61, %66 : vector<16x32xf32>
    %68 = arith.mulf %67, %67 : vector<16x32xf32>
    %cst_23 = arith.constant dense<0.000000e+00> : vector<16xf32>
    %69 = vector.multi_reduction <add>, %68, %cst_23 [1] : vector<16x32xf32> to vector<16xf32>
    %70 = vector.shape_cast %69 : vector<16xf32> to vector<16x1xf32>
    %cst_24 = arith.constant 0.0322580636 : f32
    %71 = vector.broadcast %cst_24 : f32 to vector<16x1xf32>
    %72 = arith.mulf %70, %71 : vector<16x1xf32>
    %73 = math.sqrt %72 : vector<16x1xf32>
    %74 = vector.extract_strided_slice %2 {offsets = [0, 0], sizes = [1, 32], strides = [1, 1]} : vector<10x32xf32> to vector<1x32xf32>
    %75 = vector.broadcast %74 : vector<1x32xf32> to vector<16x32xf32>
    %76 = arith.mulf %75, %67 : vector<16x32xf32>
    %cst_25 = arith.constant 9.99999997E-7 : f32
    %77 = vector.broadcast %cst_25 : f32 to vector<16x1xf32>
    %78 = arith.addf %73, %77 : vector<16x1xf32>
    %79 = vector.broadcast %78 : vector<16x1xf32> to vector<16x32xf32>
    %80 = arith.divf %76, %79 : vector<16x32xf32>
    %81 = vector.extract_strided_slice %2 {offsets = [1, 0], sizes = [1, 32], strides = [1, 1]} : vector<10x32xf32> to vector<1x32xf32>
    %82 = vector.broadcast %81 : vector<1x32xf32> to vector<16x32xf32>
    %83 = arith.addf %80, %82 : vector<16x32xf32>
    %c0_26 = arith.constant 0 : index
    %c0_27 = arith.constant 0 : index
    %84 = vector.load %arg7[%c0_26, %c0_27] : memref<32x32xf32, #tpu.memory_space<vmem>>, vector<32x32xf32>
    %cst_28 = arith.constant dense<0.000000e+00> : vector<16x32xf32>
    %85 = tpu.matmul %83, %84, %cst_28 {dimension_numbers = #tpu.dot_dimension_numbers<[1], [0], [0], [1], [0, 0, 1, 1], [], []>} : vector<16x32xf32>, vector<32x32xf32>, vector<16x32xf32> -> vector<16x32xf32>
    %86 = vector.extract_strided_slice %2 {offsets = [7, 0], sizes = [1, 32], strides = [1, 1]} : vector<10x32xf32> to vector<1x32xf32>
    %87 = vector.broadcast %86 : vector<1x32xf32> to vector<16x32xf32>
    %88 = arith.addf %85, %87 : vector<16x32xf32>
    %c0_29 = arith.constant 0 : index
    %c0_30 = arith.constant 0 : index
    %89 = vector.load %arg8[%c0_29, %c0_30] : memref<32x64xf32, #tpu.memory_space<vmem>>, vector<32x64xf32>
    %cst_31 = arith.constant dense<0.000000e+00> : vector<32x64xf32>
    %90 = tpu.matmul %1, %89, %cst_31 {dimension_numbers = #tpu.dot_dimension_numbers<[1], [0], [0], [1], [0, 0, 1, 1], [], []>} : vector<32x32xf32>, vector<32x64xf32>, vector<32x64xf32> -> vector<32x64xf32>
    %c0_32 = arith.constant 0 : index
    %c0_33 = arith.constant 0 : index
    %91 = vector.load %arg9[%c0_32, %c0_33] : memref<1x64xf32, #tpu.memory_space<vmem>>, vector<1x64xf32>
    %92 = vector.broadcast %91 : vector<1x64xf32> to vector<32x64xf32>
    %93 = arith.addf %90, %92 : vector<32x64xf32>
    %94 = vector.extract_strided_slice %93 {offsets = [0, 0], sizes = [32, 32], strides = [1, 1]} : vector<32x64xf32> to vector<32x32xf32>
    %95 = vector.extract_strided_slice %93 {offsets = [0, 32], sizes = [32, 32], strides = [1, 1]} : vector<32x64xf32> to vector<32x32xf32>
    %c0_34 = arith.constant 0 : index
    %c0_35 = arith.constant 0 : index
    %96 = vector.load %arg3[%c0_34, %c0_35] : memref<16x32xf32, #tpu.memory_space<vmem>>, vector<16x32xf32>
    %c0_36 = arith.constant 0 : index
    %c0_37 = arith.constant 0 : index
    %c0_38 = arith.constant 0 : index
    %97 = vector.load %arg10[%c0_36, %c0_37, %c0_38] : memref<8x4x32xf32, #tpu.memory_space<vmem>>, vector<8x4x32xf32>
    %98 = vector.extract_strided_slice %2 {offsets = [8, 0], sizes = [1, 32], strides = [1, 1]} : vector<10x32xf32> to vector<1x32xf32>
    %99 = vector.extract_strided_slice %88 {offsets = [0, 0], sizes = [16, 4], strides = [1, 1]} : vector<16x32xf32> to vector<16x4xf32>
    %100 = vector.extract_strided_slice %88 {offsets = [0, 4], sizes = [16, 4], strides = [1, 1]} : vector<16x32xf32> to vector<16x4xf32>
    %101 = vector.extract_strided_slice %88 {offsets = [0, 8], sizes = [16, 4], strides = [1, 1]} : vector<16x32xf32> to vector<16x4xf32>
    %102 = vector.extract_strided_slice %88 {offsets = [0, 12], sizes = [16, 4], strides = [1, 1]} : vector<16x32xf32> to vector<16x4xf32>
    %103 = vector.extract_strided_slice %88 {offsets = [0, 16], sizes = [16, 4], strides = [1, 1]} : vector<16x32xf32> to vector<16x4xf32>
    %104 = vector.extract_strided_slice %88 {offsets = [0, 20], sizes = [16, 4], strides = [1, 1]} : vector<16x32xf32> to vector<16x4xf32>
    %105 = vector.extract_strided_slice %88 {offsets = [0, 24], sizes = [16, 4], strides = [1, 1]} : vector<16x32xf32> to vector<16x4xf32>
    %106 = vector.extract_strided_slice %88 {offsets = [0, 28], sizes = [16, 4], strides = [1, 1]} : vector<16x32xf32> to vector<16x4xf32>
    %107 = vector.shape_cast %99 : vector<16x4xf32> to vector<1x16x4xf32>
    %108 = vector.shape_cast %100 : vector<16x4xf32> to vector<1x16x4xf32>
    %109 = vector.shape_cast %101 : vector<16x4xf32> to vector<1x16x4xf32>
    %110 = vector.shape_cast %102 : vector<16x4xf32> to vector<1x16x4xf32>
    %111 = vector.shape_cast %103 : vector<16x4xf32> to vector<1x16x4xf32>
    %112 = vector.shape_cast %104 : vector<16x4xf32> to vector<1x16x4xf32>
    %113 = vector.shape_cast %105 : vector<16x4xf32> to vector<1x16x4xf32>
    %114 = vector.shape_cast %106 : vector<16x4xf32> to vector<1x16x4xf32>
    %115 = tpu.concatenate %107, %108, %109, %110, %111, %112, %113, %114 in 0 : vector<1x16x4xf32>, vector<1x16x4xf32>, vector<1x16x4xf32>, vector<1x16x4xf32>, vector<1x16x4xf32>, vector<1x16x4xf32>, vector<1x16x4xf32>, vector<1x16x4xf32> -> vector<8x16x4xf32>
    %116 = vector.extract_strided_slice %94 {offsets = [0, 0], sizes = [32, 4], strides = [1, 1]} : vector<32x32xf32> to vector<32x4xf32>
    %117 = vector.extract_strided_slice %94 {offsets = [0, 4], sizes = [32, 4], strides = [1, 1]} : vector<32x32xf32> to vector<32x4xf32>
    %118 = vector.extract_strided_slice %94 {offsets = [0, 8], sizes = [32, 4], strides = [1, 1]} : vector<32x32xf32> to vector<32x4xf32>
    %119 = vector.extract_strided_slice %94 {offsets = [0, 12], sizes = [32, 4], strides = [1, 1]} : vector<32x32xf32> to vector<32x4xf32>
    %120 = vector.extract_strided_slice %94 {offsets = [0, 16], sizes = [32, 4], strides = [1, 1]} : vector<32x32xf32> to vector<32x4xf32>
    %121 = vector.extract_strided_slice %94 {offsets = [0, 20], sizes = [32, 4], strides = [1, 1]} : vector<32x32xf32> to vector<32x4xf32>
    %122 = vector.extract_strided_slice %94 {offsets = [0, 24], sizes = [32, 4], strides = [1, 1]} : vector<32x32xf32> to vector<32x4xf32>
    %123 = vector.extract_strided_slice %94 {offsets = [0, 28], sizes = [32, 4], strides = [1, 1]} : vector<32x32xf32> to vector<32x4xf32>
    %124 = vector.shape_cast %116 : vector<32x4xf32> to vector<1x32x4xf32>
    %125 = vector.shape_cast %117 : vector<32x4xf32> to vector<1x32x4xf32>
    %126 = vector.shape_cast %118 : vector<32x4xf32> to vector<1x32x4xf32>
    %127 = vector.shape_cast %119 : vector<32x4xf32> to vector<1x32x4xf32>
    %128 = vector.shape_cast %120 : vector<32x4xf32> to vector<1x32x4xf32>
    %129 = vector.shape_cast %121 : vector<32x4xf32> to vector<1x32x4xf32>
    %130 = vector.shape_cast %122 : vector<32x4xf32> to vector<1x32x4xf32>
    %131 = vector.shape_cast %123 : vector<32x4xf32> to vector<1x32x4xf32>
    %132 = tpu.concatenate %124, %125, %126, %127, %128, %129, %130, %131 in 0 : vector<1x32x4xf32>, vector<1x32x4xf32>, vector<1x32x4xf32>, vector<1x32x4xf32>, vector<1x32x4xf32>, vector<1x32x4xf32>, vector<1x32x4xf32>, vector<1x32x4xf32> -> vector<8x32x4xf32>
    %133 = vector.extract_strided_slice %95 {offsets = [0, 0], sizes = [32, 4], strides = [1, 1]} : vector<32x32xf32> to vector<32x4xf32>
    %134 = vector.extract_strided_slice %95 {offsets = [0, 4], sizes = [32, 4], strides = [1, 1]} : vector<32x32xf32> to vector<32x4xf32>
    %135 = vector.extract_strided_slice %95 {offsets = [0, 8], sizes = [32, 4], strides = [1, 1]} : vector<32x32xf32> to vector<32x4xf32>
    %136 = vector.extract_strided_slice %95 {offsets = [0, 12], sizes = [32, 4], strides = [1, 1]} : vector<32x32xf32> to vector<32x4xf32>
    %137 = vector.extract_strided_slice %95 {offsets = [0, 16], sizes = [32, 4], strides = [1, 1]} : vector<32x32xf32> to vector<32x4xf32>
    %138 = vector.extract_strided_slice %95 {offsets = [0, 20], sizes = [32, 4], strides = [1, 1]} : vector<32x32xf32> to vector<32x4xf32>
    %139 = vector.extract_strided_slice %95 {offsets = [0, 24], sizes = [32, 4], strides = [1, 1]} : vector<32x32xf32> to vector<32x4xf32>
    %140 = vector.extract_strided_slice %95 {offsets = [0, 28], sizes = [32, 4], strides = [1, 1]} : vector<32x32xf32> to vector<32x4xf32>
    %141 = vector.shape_cast %133 : vector<32x4xf32> to vector<1x32x4xf32>
    %142 = vector.shape_cast %134 : vector<32x4xf32> to vector<1x32x4xf32>
    %143 = vector.shape_cast %135 : vector<32x4xf32> to vector<1x32x4xf32>
    %144 = vector.shape_cast %136 : vector<32x4xf32> to vector<1x32x4xf32>
    %145 = vector.shape_cast %137 : vector<32x4xf32> to vector<1x32x4xf32>
    %146 = vector.shape_cast %138 : vector<32x4xf32> to vector<1x32x4xf32>
    %147 = vector.shape_cast %139 : vector<32x4xf32> to vector<1x32x4xf32>
    %148 = vector.shape_cast %140 : vector<32x4xf32> to vector<1x32x4xf32>
    %149 = tpu.concatenate %141, %142, %143, %144, %145, %146, %147, %148 in 0 : vector<1x32x4xf32>, vector<1x32x4xf32>, vector<1x32x4xf32>, vector<1x32x4xf32>, vector<1x32x4xf32>, vector<1x32x4xf32>, vector<1x32x4xf32>, vector<1x32x4xf32> -> vector<8x32x4xf32>
    "tpu.trace_start"() <{level = 10 : i32, message = "hqd,hkd->hqk"}> : () -> ()
    %cst_39 = arith.constant dense<0.000000e+00> : vector<8x16x32xf32>
    %150 = tpu.matmul %115, %132, %cst_39 {dimension_numbers = #tpu.dot_dimension_numbers<[2], [2], [1], [1], [0, 0, 0, 1, 1, 1], [0], [0]>} : vector<8x16x4xf32>, vector<8x32x4xf32>, vector<8x16x32xf32> -> vector<8x16x32xf32>
    "tpu.trace_stop"() : () -> ()
    %cst_40 = arith.constant 5.000000e-01 : f32
    %151 = vector.broadcast %cst_40 : f32 to vector<8x16x32xf32>
    %152 = arith.mulf %150, %151 : vector<8x16x32xf32>
    %153 = vector.shape_cast %96 : vector<16x32xf32> to vector<1x16x32xf32>
    %154 = vector.broadcast %153 : vector<1x16x32xf32> to vector<8x16x32xf32>
    %155 = arith.addf %152, %154 : vector<8x16x32xf32>
    %cst_41 = arith.constant dense<0xFF800000> : vector<8x16xf32>
    %156 = vector.multi_reduction <maximumf>, %155, %cst_41 [2] : vector<8x16x32xf32> to vector<8x16xf32>
    %157 = vector.shape_cast %156 : vector<8x16xf32> to vector<8x16x1xf32>
    %158 = vector.broadcast %157 : vector<8x16x1xf32> to vector<8x16x32xf32>
    %159 = arith.subf %155, %158 : vector<8x16x32xf32>
    %160 = math.exp %159 : vector<8x16x32xf32>
    %cst_42 = arith.constant dense<0.000000e+00> : vector<8x16xf32>
    %161 = vector.multi_reduction <add>, %160, %cst_42 [2] : vector<8x16x32xf32> to vector<8x16xf32>
    %162 = vector.shape_cast %161 : vector<8x16xf32> to vector<8x16x1xf32>
    %163 = vector.broadcast %162 : vector<8x16x1xf32> to vector<8x16x32xf32>
    %164 = arith.divf %160, %163 : vector<8x16x32xf32>
    "tpu.trace_start"() <{level = 10 : i32, message = "hqk,hkd->hqd"}> : () -> ()
    %cst_43 = arith.constant dense<0.000000e+00> : vector<8x16x4xf32>
    %165 = tpu.matmul %164, %149, %cst_43 {dimension_numbers = #tpu.dot_dimension_numbers<[2], [1], [1], [2], [0, 0, 0, 1, 1, 2], [0], [0]>} : vector<8x16x32xf32>, vector<8x32x4xf32>, vector<8x16x4xf32> -> vector<8x16x4xf32>
    "tpu.trace_stop"() : () -> ()
    "tpu.trace_start"() <{level = 10 : i32, message = "hqd,hdo->hqo"}> : () -> ()
    %cst_44 = arith.constant dense<0.000000e+00> : vector<8x16x32xf32>
    %166 = tpu.matmul %165, %97, %cst_44 {dimension_numbers = #tpu.dot_dimension_numbers<[2], [1], [1], [2], [0, 0, 0, 1, 1, 2], [0], [0]>} : vector<8x16x4xf32>, vector<8x4x32xf32>, vector<8x16x32xf32> -> vector<8x16x32xf32>
    "tpu.trace_stop"() : () -> ()
    %cst_45 = arith.constant dense<0.000000e+00> : vector<16x32xf32>
    %167 = vector.multi_reduction <add>, %166, %cst_45 [0] : vector<8x16x32xf32> to vector<16x32xf32>
    %168 = vector.broadcast %98 : vector<1x32xf32> to vector<16x32xf32>
    %169 = arith.addf %167, %168 : vector<16x32xf32>
    %170 = arith.addf %83, %169 : vector<16x32xf32>
    %cst_46 = arith.constant dense<0.000000e+00> : vector<16xf32>
    %171 = vector.multi_reduction <add>, %170, %cst_46 [1] : vector<16x32xf32> to vector<16xf32>
    %172 = vector.shape_cast %171 : vector<16xf32> to vector<16x1xf32>
    %cst_47 = arith.constant 3.200000e+01 : f32
    %173 = vector.broadcast %cst_47 : f32 to vector<16x1xf32>
    %174 = arith.divf %172, %173 : vector<16x1xf32>
    %175 = vector.broadcast %174 : vector<16x1xf32> to vector<16x32xf32>
    %176 = arith.subf %170, %175 : vector<16x32xf32>
    %177 = arith.mulf %176, %176 : vector<16x32xf32>
    %cst_48 = arith.constant dense<0.000000e+00> : vector<16xf32>
    %178 = vector.multi_reduction <add>, %177, %cst_48 [1] : vector<16x32xf32> to vector<16xf32>
    %179 = vector.shape_cast %178 : vector<16xf32> to vector<16x1xf32>
    %cst_49 = arith.constant 0.0322580636 : f32
    %180 = vector.broadcast %cst_49 : f32 to vector<16x1xf32>
    %181 = arith.mulf %179, %180 : vector<16x1xf32>
    %182 = math.sqrt %181 : vector<16x1xf32>
    %183 = vector.extract_strided_slice %2 {offsets = [2, 0], sizes = [1, 32], strides = [1, 1]} : vector<10x32xf32> to vector<1x32xf32>
    %184 = vector.broadcast %183 : vector<1x32xf32> to vector<16x32xf32>
    %185 = arith.mulf %184, %176 : vector<16x32xf32>
    %cst_50 = arith.constant 9.99999997E-7 : f32
    %186 = vector.broadcast %cst_50 : f32 to vector<16x1xf32>
    %187 = arith.addf %182, %186 : vector<16x1xf32>
    %188 = vector.broadcast %187 : vector<16x1xf32> to vector<16x32xf32>
    %189 = arith.divf %185, %188 : vector<16x32xf32>
    %190 = vector.extract_strided_slice %2 {offsets = [3, 0], sizes = [1, 32], strides = [1, 1]} : vector<10x32xf32> to vector<1x32xf32>
    %191 = vector.broadcast %190 : vector<1x32xf32> to vector<16x32xf32>
    %192 = arith.addf %189, %191 : vector<16x32xf32>
    %c0_51 = arith.constant 0 : index
    %c0_52 = arith.constant 0 : index
    %193 = vector.load %arg11[%c0_51, %c0_52] : memref<32x64xf32, #tpu.memory_space<vmem>>, vector<32x64xf32>
    %cst_53 = arith.constant dense<0.000000e+00> : vector<16x64xf32>
    %194 = tpu.matmul %192, %193, %cst_53 {dimension_numbers = #tpu.dot_dimension_numbers<[1], [0], [0], [1], [0, 0, 1, 1], [], []>} : vector<16x32xf32>, vector<32x64xf32>, vector<16x64xf32> -> vector<16x64xf32>
    %c0_54 = arith.constant 0 : index
    %c0_55 = arith.constant 0 : index
    %195 = vector.load %arg12[%c0_54, %c0_55] : memref<1x64xf32, #tpu.memory_space<vmem>>, vector<1x64xf32>
    %196 = vector.broadcast %195 : vector<1x64xf32> to vector<16x64xf32>
    %197 = arith.addf %194, %196 : vector<16x64xf32>
    %cst_56 = arith.constant 0.000000e+00 : f32
    %198 = vector.broadcast %cst_56 : f32 to vector<16x64xf32>
    %199 = arith.maximumf %197, %198 : vector<16x64xf32>
    %c0_57 = arith.constant 0 : index
    %c0_58 = arith.constant 0 : index
    %200 = vector.load %arg13[%c0_57, %c0_58] : memref<64x32xf32, #tpu.memory_space<vmem>>, vector<64x32xf32>
    %cst_59 = arith.constant dense<0.000000e+00> : vector<16x32xf32>
    %201 = tpu.matmul %199, %200, %cst_59 {dimension_numbers = #tpu.dot_dimension_numbers<[1], [0], [0], [1], [0, 0, 1, 1], [], []>} : vector<16x64xf32>, vector<64x32xf32>, vector<16x32xf32> -> vector<16x32xf32>
    %202 = vector.extract_strided_slice %2 {offsets = [9, 0], sizes = [1, 32], strides = [1, 1]} : vector<10x32xf32> to vector<1x32xf32>
    %203 = vector.broadcast %202 : vector<1x32xf32> to vector<16x32xf32>
    %204 = arith.addf %201, %203 : vector<16x32xf32>
    %205 = arith.addf %192, %204 : vector<16x32xf32>
    %cst_60 = arith.constant dense<0.000000e+00> : vector<16xf32>
    %206 = vector.multi_reduction <add>, %205, %cst_60 [1] : vector<16x32xf32> to vector<16xf32>
    %207 = vector.shape_cast %206 : vector<16xf32> to vector<16x1xf32>
    %cst_61 = arith.constant 3.200000e+01 : f32
    %208 = vector.broadcast %cst_61 : f32 to vector<16x1xf32>
    %209 = arith.divf %207, %208 : vector<16x1xf32>
    %210 = vector.broadcast %209 : vector<16x1xf32> to vector<16x32xf32>
    %211 = arith.subf %205, %210 : vector<16x32xf32>
    %212 = arith.mulf %211, %211 : vector<16x32xf32>
    %cst_62 = arith.constant dense<0.000000e+00> : vector<16xf32>
    %213 = vector.multi_reduction <add>, %212, %cst_62 [1] : vector<16x32xf32> to vector<16xf32>
    %214 = vector.shape_cast %213 : vector<16xf32> to vector<16x1xf32>
    %cst_63 = arith.constant 0.0322580636 : f32
    %215 = vector.broadcast %cst_63 : f32 to vector<16x1xf32>
    %216 = arith.mulf %214, %215 : vector<16x1xf32>
    %217 = math.sqrt %216 : vector<16x1xf32>
    %218 = vector.extract_strided_slice %2 {offsets = [4, 0], sizes = [1, 32], strides = [1, 1]} : vector<10x32xf32> to vector<1x32xf32>
    %219 = vector.broadcast %218 : vector<1x32xf32> to vector<16x32xf32>
    %220 = arith.mulf %219, %211 : vector<16x32xf32>
    %cst_64 = arith.constant 9.99999997E-7 : f32
    %221 = vector.broadcast %cst_64 : f32 to vector<16x1xf32>
    %222 = arith.addf %217, %221 : vector<16x1xf32>
    %223 = vector.broadcast %222 : vector<16x1xf32> to vector<16x32xf32>
    %224 = arith.divf %220, %223 : vector<16x32xf32>
    %225 = vector.extract_strided_slice %2 {offsets = [5, 0], sizes = [1, 32], strides = [1, 1]} : vector<10x32xf32> to vector<1x32xf32>
    %226 = vector.broadcast %225 : vector<1x32xf32> to vector<16x32xf32>
    %227 = arith.addf %224, %226 : vector<16x32xf32>
    %c0_65 = arith.constant 0 : index
    %c0_66 = arith.constant 0 : index
    %228 = vector.load %arg15[%c0_65, %c0_66] : memref<16x32xf32, #tpu.memory_space<vmem>>, vector<16x32xf32>
    tpu.vector_store %arg15[%c0_65, %c0_66], %227 {strides = array<i32>} : memref<16x32xf32, #tpu.memory_space<vmem>>, vector<16x32xf32>,
    return
  }
}

</mosaic_0001>

<bundles_post_ra>
// kernel: transformer_dec_layer.1
= control target key start
LH: loop header
LB: loop body
LE: loop exit
PB: predicated region body
PF: predicated region fallthrough
CT: control target
= control target key end

     0   :  { %s4197_s0 = inlined_call_operand.vmem [shape: f32[16,32], index: 0, kind: input, shape index: {}]   ;;  %s4198_s1 = inlined_call_operand.vmem [shape: f32[32,32], index: 1, kind: input, shape index: {}]   ;;  %s4199_s2 = inlined_call_operand.vmem [shape: f32[16,16], index: 2, kind: input, shape index: {}]   ;;  %s4200_s3 = inlined_call_operand.vmem [shape: f32[16,32], index: 3, kind: input, shape index: {}]   ;;  %s4201_s4 = inlined_call_operand.vmem [shape: f32[32,96], index: 4, kind: input, shape index: {}]   ;;  %s4202_s5 = inlined_call_operand.vmem [shape: f32[1,96], index: 5, kind: input, shape index: {}]   ;;  %s4203_s6 = inlined_call_operand.vmem [shape: f32[4,8,32], index: 6, kind: input, shape index: {}]   ;;  %s4204_s7 = inlined_call_operand.vmem [shape: f32[32,32], index: 7, kind: input, shape index: {}]   ;;  %s4205_s8 = inlined_call_operand.vmem [shape: f32[32,64], index: 8, kind: input, shape index: {}]   ;;  %s4206_s9 = inlined_call_operand.vmem [shape: f32[1,64], index: 9, kind: input, shape index: {}]   ;;  %s4207_s10 = inlined_call_operand.vmem [shape: f32[8,4,32], index: 10, kind: input, shape index: {}]   ;;  %s4208_s11 = inlined_call_operand.vmem [shape: f32[32,64], index: 11, kind: input, shape index: {}]   ;;  %s4209_s12 = inlined_call_operand.vmem [shape: f32[1,64], index: 12, kind: input, shape index: {}]   ;;  %s4210_s13 = inlined_call_operand.vmem [shape: f32[64,32], index: 13, kind: input, shape index: {}]   ;;  %s4211_s14 = inlined_call_operand.vmem [shape: f32[10,32], index: 14, kind: input, shape index: {}]   ;;  %s4212_s15 = inlined_call_operand.hbm [shape: f32[16,32], index: 15, kind: output, shape index: {}]  }
   0x1   :  { %v62_v0 = vld [vmem:[%s4201_s4 + $0x18] sm:$0xff]  ;;  %v61_v1 = vld [vmem:[%s4201_s4 + $0x10] sm:$0xff]  ;;  %v60_v2 = vld [vmem:[%s4201_s4 + $0x8] sm:$0xff] }
   0x2   :  { %86 = vmatpush.msra.mxu0 %v62_v0  ;;  %2727 = vmatpush.msra.mxu2 %v62_v0 }
   0x4   :  { %87 = vmatpush.msra.mxu0 %v61_v1  ;;  %2728 = vmatpush.msra.mxu2 %v61_v1 }
   0x5   :  { %20 = vsyncpa [#allocation3], 0  ;;  %v59_v3 = vld [vmem:[%s4201_s4] sm:$0xff]  ;;  %vm67_vm0 = vcmask 261120   ;;  %v3111_v5 = vld [vmem:[%s4197_s0 + $0x8] sm:$0xff]  ;;  %s2998_s16 = smov 120  }
   0x6   :  { %88 = vmatpush.msra.mxu0 %v60_v2  ;;  %2729 = vmatpush.msra.mxu2 %v60_v2  ;;  %v3106_v4 = vld [vmem:[%s4197_s0] sm:$0xff]  ;;  %s2999_s0 = smov 104   ;;  %s3000_s17 = smov 112   ;;  %vm121_vm1 = vcmask 64512   ;;  %vm274_vm2 = vcmask 130048   ;;  %v98_v37 = vld [vmem:[%s4199_s2 + $0x8] sm:$0xff] }
   0x7   :  { %v2846_v6 = vld [vmem:[%s4202_s5] ss:$0 sm:$0xff]  ;;  %s3001_s5 = smov 96   ;;  %s3004_s30 = smov 116  }
   0x8   :  { %89 = vmatpush.msra.mxu0 %v59_v3  ;;  %2730 = vmatpush.msra.mxu2 %v59_v3  ;;  %v97_v26 = vld [vmem:[%s4199_s2] sm:$0xff]  ;;  %s3002_s2 = smov 64   ;;  %s3006_s18 = smov 100  }
   0x9   :  { %2595 = vmatmul.msk.f32.vlgmr.msra.gmra.mxu0 %vm67_vm0, %v3106_v4  ;;  %2596 = vmatmul.msk.f32.vlgmr.msra.gmra.mxu2 %vm67_vm0, %v3111_v5  ;;  %s3007_s19 = smov 108   ;;  %s2583_s25 = sshll.u32 %s4212_s15, 4  ;;  %s2584_s25 = int_to_ptr.hbm [resolvable:$true] %s2583_s25 }
  0x86   :  { %v91_v7 = vpop.f32.mrf.mxu0 }
  0x87   :  { %v3120_v8 = vadd.f32 %v2846_v6, %v91_v7 }
  0x89   :  { %105 = vrot.lane.b32.xlu1 %v3120_v8, %s2998_s16 }
  0x8c   :  { %v94_v9 = vpop.f32.mrf.mxu2 }
  0x8d   :  { %v3124_v10 = vadd.f32 %v2846_v6, %v94_v9 }
  0x8f   :  { %115 = vrot.lane.b32.xlu2 %v3124_v10, %s2999_s0  ;;  %107 = vrot.lane.b32.xlu0 %v3124_v10, %s2998_s16 }
  0x91   :  { %109 = vrot.lane.b32.xlu1 %v3120_v8, %s3000_s17 }
  0x97   :  { %111 = vrot.lane.b32.xlu0 %v3124_v10, %s3000_s17  ;;  %113 = vrot.lane.b32.xlu2 %v3120_v8, %s2999_s0 }
  0x99   :  { %117 = vrot.lane.b32.xlu1 %v3120_v8, %s3001_s5 }
  0x9f   :  { %119 = vrot.lane.b32.xlu0 %v3124_v10, %s3001_s5 }
  0xe9   :  { %v3140_v11 = vpop.permute.xlu2 %115 }
  0xf1   :  { %v3150_v14 = vpop.permute.xlu2 %113 }
  0xfb   :  { %v3142_v12 = vpop.permute.xlu1 %105 }
  0xfc   :  { %153 = vrot.lane.b32.xlu1 %v3142_v12, %s3001_s5 }
 0x101   :  { %v3146_v13 = vpop.permute.xlu0 %107 }
 0x102   :  { %155 = vrot.lane.b32.xlu2 %v3146_v13, %s3001_s5  ;;  %v2746_v0 = vpack.i.bf16 %v3142_v12, %v3146_v13 }
 0x103   :  { %v3154_v15 = vpop.permute.xlu1 %109 }
 0x104   :  { %223 = vrot.lane.b32.xlu1 %v3150_v14, %s3001_s5 }
 0x109   :  { %v3156_v16 = vpop.permute.xlu0 %111 }
 0x10a   :  { %190 = vrot.lane.b32.xlu0 %v3156_v16, %s3001_s5  ;;  %188 = vrot.lane.b32.xlu2 %v3154_v15, %s3001_s5 }
 0x10b   :  { %v118_v18 = vpop.permute.xlu1 %117 }
 0x111   :  { %v120_v17 = vpop.permute.xlu0 %119 }
 0x112   :  { %225 = vrot.lane.b32.xlu0 %v3140_v11, %s3001_s5  ;;  %2597 = vmatpush.xpose.msk.msra.mxu1 %vm121_vm1, %v120_v17 }
 0x113   :  { %2731 = vmatpush.xpose.msk.msra.mxu3 %vm121_vm1, %v120_v17 }
 0x116   :  { %2598 = vmatpush.xpose.msk.msra.mxu1 %vm121_vm1, %v118_v18 }
 0x117   :  { %2732 = vmatpush.xpose.msk.msra.mxu3 %vm121_vm1, %v118_v18 }
 0x119   :  { %2599 = vmatmul.msk.f32.vlgmr.msra.gmra.mxu1 %vm121_vm1, %v3120_v8 }
 0x11a   :  { %2600 = vmatmul.msk.f32.vlgmr.msra.gmra.mxu3 %vm121_vm1, %v3124_v10 }
 0x15c   :  { %v156_v19 = vpop.permute.xlu2 %155 }
 0x15d   :  { %2601 = vmatpush.xpose.msk.msrb.mxu2 %vm121_vm1, %v156_v19 }
 0x164   :  { %v189_v22 = vpop.permute.xlu2 %188 }
 0x16e   :  { %v154_v20 = vpop.permute.xlu1 %153 }
 0x16f   :  { %2602 = vmatpush.xpose.msk.msrb.mxu2 %vm121_vm1, %v154_v20 }
 0x172   :  { %2603 = vmatmul.msk.f32.vlgmr.msrb.gmra.mxu2 %vm121_vm1, %v3142_v12 }
 0x176   :  { %v224_v24 = vpop.permute.xlu1 %223 }
 0x17a   :  { %2604 = vmatmul.msk.f32.gmra.mxu2 %vm121_vm1, %v3146_v13 }
 0x17c   :  { %v191_v21 = vpop.permute.xlu0 %190 }
 0x17d   :  { %2605 = vmatpush.xpose.msk.msrb.mxu3 %vm121_vm1, %v191_v21 }
 0x181   :  { %2606 = vmatpush.xpose.msk.msrb.mxu3 %vm121_vm1, %v189_v22 }
 0x184   :  { %v226_v23 = vpop.permute.xlu0 %225  ;;  %2607 = vmatmul.msk.f32.vlgmr.msrb.gmra.mxu3 %vm121_vm1, %v3154_v15 }
 0x185   :  { %2609 = vmatpush.xpose.msk.msrb.mxu0 %vm121_vm1, %v226_v23 }
 0x189   :  { %2610 = vmatpush.xpose.msk.msrb.mxu0 %vm121_vm1, %v224_v24 }
 0x18c   :  { %2608 = vmatmul.msk.f32.gmra.mxu3 %vm121_vm1, %v3156_v16  ;;  %2611 = vmatmul.msk.f32.vlgmr.msrb.gmra.mxu0 %vm121_vm1, %v3150_v14 }
 0x194   :  { %2612 = vmatmul.msk.f32.gmra.mxu0 %vm121_vm1, %v3140_v11 }
 0x196   :  { %v147_v25 = vpop.f32.mrf.mxu1 }
 0x197   :  { %v258_v27 = vmul.f32 0.35355338, %v147_v25 }
 0x199   :  { %v266_v28 = vadd.f32 %v258_v27, %v97_v26 }
 0x19b   :  { %v275_v29 = vsel %vm274_vm2, %v266_v28, -inf }
 0x19c   :  { %276 = vmax.xlane.f32.xlu2 %v275_v29 }
 0x19d   :  { %v150_v36 = vpop.f32.mrf.mxu3 }
 0x19e   :  { %v259_v39 = vmul.f32 0.35355338, %v150_v36 }
 0x1a0   :  { %v267_v41 = vadd.f32 %v259_v39, %v98_v37 }
 0x1a2   :  { %v278_v45 = vsel %vm274_vm2, %v267_v41, -inf }
 0x1f5   :  { %v182_v30 = vpop.f32.mrf.mxu2 }
 0x1f6   :  { %v260_v31 = vmul.f32 0.35355338, %v182_v30 }
 0x1f8   :  { %v268_v32 = vadd.f32 %v260_v31, %v97_v26 }
 0x1fa   :  { %v281_v33 = vsel %vm274_vm2, %v268_v32, -inf }
 0x1fb   :  { %282 = vmax.xlane.f32.xlu2 %v281_v33 }
 0x1fd   :  { %v185_v34 = vpop.f32.mrf.mxu2 }
 0x1fe   :  { %v261_v35 = vmul.f32 0.35355338, %v185_v34 }
 0x200   :  { %v3198_v38 = vadd.f32 %v261_v35, %v98_v37 }
 0x202   :  { %v284_v40 = vsel %vm274_vm2, %v3198_v38, -inf }
 0x203   :  { %285 = vmax.xlane.f32.xlu1 %v284_v40 }
 0x207   :  { %v217_v42 = vpop.f32.mrf.mxu3 }
 0x208   :  { %v262_v47 = vmul.f32 0.35355338, %v217_v42 }
 0x209   :  { %v252_v43 = vpop.f32.mrf.mxu0 }
 0x20a   :  { %v264_v44 = vmul.f32 0.35355338, %v252_v43  ;;  %v270_v56 = vadd.f32 %v262_v47, %v97_v26  ;;  %v2756_v47 = vpack.i.bf16 %v3120_v8, %v3124_v10 }
 0x20b   :  { %279 = vmax.xlane.f32.xlu1 %v278_v45 }
 0x20c   :  { %v272_v46 = vadd.f32 %v264_v44, %v97_v26  ;;  %v287_v59 = vsel %vm274_vm2, %v270_v56, -inf }
 0x20e   :  { %v293_v48 = vsel %vm274_vm2, %v272_v46, -inf }
 0x20f   :  { %v220_v49 = vpop.f32.mrf.mxu3  ;;  %v277_v50 = vpop.xlane.xlu2 %276  ;;  %294 = vmax.xlane.f32.xlu0 %v293_v48  ;;  %v2751_v48 = vpack.i.bf16 %v3154_v15, %v3156_v16 }
 0x210   :  { %v263_v51 = vmul.f32 0.35355338, %v220_v49  ;;  %v299_v52 = vsub.f32 %v266_v28, %v277_v50  ;;  %v2761_v49 = vpack.i.bf16 %v3150_v14, %v3140_v11 }
 0x211   :  { %v255_v53 = vpop.f32.mrf.mxu0 }
 0x212   :  { %v307_v54 = vmul.f32 1.442695, %v299_v52  ;;  %v271_v55 = vadd.f32 %v263_v51, %v98_v37  ;;  %v265_v57 = vmul.f32 0.35355338, %v255_v53 }
 0x214   :  { %2849 = vpow2.f32 %v307_v54  ;;  %v290_v58 = vsel %vm274_vm2, %v271_v55, -inf  ;;  %v273_v60 = vadd.f32 %v265_v57, %v98_v37 }
 0x215   :  { %291 = vmax.xlane.f32.xlu2 %v290_v58 }
 0x216   :  { %v296_v63 = vsel %vm274_vm2, %v273_v60, -inf }
 0x217   :  { %288 = vmax.xlane.f32.xlu0 %v287_v59 }
 0x21a   :  { %v3206_v61 = vpop.eup %2849 }
 0x21b   :  { %v323_v62 = vsel %vm274_vm2, %v3206_v61, 0.0 }
 0x21c   :  { %324 = vadd.xlane.f32.xlu1 %v323_v62 }
 0x21d   :  { %297 = vmax.xlane.f32.xlu2 %v296_v63 }
 0x22b   :  { %2747 = vrot.lane.b32.xlu0 %v2746_v0, %s3002_s2 }
 0x26e   :  { %v283_v1 = vpop.xlane.xlu2 %282 }
 0x26f   :  { %v301_v2 = vsub.f32 %v268_v32, %v283_v1 }
 0x271   :  { %v311_v3 = vmul.f32 1.442695, %v301_v2 }
 0x273   :  { %2851 = vpow2.f32 %v311_v3 }
 0x276   :  { %v286_v6 = vpop.xlane.xlu1 %285 }
 0x277   :  { %v302_v36 = vsub.f32 %v3198_v38, %v286_v6 }
 0x279   :  { %v3214_v7 = vpop.eup %2851  ;;  %v313_v40 = vmul.f32 1.442695, %v302_v36 }
 0x27a   :  { %v329_v9 = vsel %vm274_vm2, %v3214_v7, 0.0 }
 0x27b   :  { %330 = vadd.xlane.f32.xlu0 %v329_v9 }
 0x27e   :  { %v280_v17 = vpop.xlane.xlu1 %279 }
 0x27f   :  { %v300_v20 = vsub.f32 %v267_v41, %v280_v17 }
 0x281   :  { %v309_v12 = vmul.f32 1.442695, %v300_v20 }
 0x282   :  { %v295_v18 = vpop.xlane.xlu0 %294 }
 0x283   :  { %v305_v19 = vsub.f32 %v272_v46, %v295_v18 }
 0x285   :  { %v319_v21 = vmul.f32 1.442695, %v305_v19 }
 0x287   :  { %2853 = vpow2.f32 %v319_v21 }
 0x288   :  { %v292_v13 = vpop.xlane.xlu2 %291  ;;  %2855 = vpow2.f32 %v309_v12 }
 0x289   :  { %v304_v22 = vsub.f32 %v271_v55, %v292_v13 }
 0x28a   :  { %v289_v23 = vpop.xlane.xlu0 %288 }
 0x28b   :  { %v317_v24 = vmul.f32 1.442695, %v304_v22  ;;  %v303_v25 = vsub.f32 %v270_v56, %v289_v23 }
 0x28d   :  { %v3218_v26 = vpop.eup %2853  ;;  %2857 = vpow2.f32 %v317_v24  ;;  %v315_v27 = vmul.f32 1.442695, %v303_v25 }
 0x28e   :  { %v341_v28 = vsel %vm274_vm2, %v3218_v26, 0.0  ;;  %v3222_v31 = vpop.eup %2855 }
 0x28f   :  { %2859 = vpow2.f32 %v315_v27  ;;  %342 = vadd.xlane.f32.xlu2 %v341_v28  ;;  %v326_v39 = vsel %vm274_vm2, %v3222_v31, 0.0  ;;  %v325_v53 = vpop.xlane.xlu1 %324 }
 0x290   :  { %v298_v29 = vpop.xlane.xlu2 %297  ;;  %v358_v9 = vand.u32 2147483648, %v325_v53  ;;  %vm352_vm8 = vweird.f32 %v325_v53  ;;  %v356_v18 = vand.u32 2147483647, %v325_v53 }
 0x291   :  { %v306_v30 = vsub.f32 %v273_v60, %v298_v29 }
 0x292   :  { %v359_v24 = vor.u32 1.1754944e-38, %v358_v9  ;;  %vm357_vm10 = vcmp.eq.f32.partialorder %v356_v18, 8.507059e+37 }
 0x293   :  { %v3224_v32 = vpop.eup %2857  ;;  %v321_v33 = vmul.f32 1.442695, %v306_v30 }
 0x294   :  { %v338_v34 = vsel %vm274_vm2, %v3224_v32, 0.0 }
 0x295   :  { %v3228_v35 = vpop.eup %2859  ;;  %2861 = vpow2.f32 %v321_v33  ;;  %339 = vadd.xlane.f32.xlu0 %v338_v34 }
 0x296   :  { %v335_v37 = vsel %vm274_vm2, %v3228_v35, 0.0  ;;  %2863 = vpow2.f32 %v313_v40 }
 0x297   :  { %336 = vadd.xlane.f32.xlu1 %v335_v37  ;;  %327 = vadd.xlane.f32.xlu2 %v326_v39 }
 0x29b   :  { %v3235_v41 = vpop.eup %2861 }
 0x29c   :  { %v344_v44 = vsel %vm274_vm2, %v3235_v41, 0.0  ;;  %v3239_v45 = vpop.eup %2863 }
 0x29d   :  { %v2748_v42 = vpop.permute.xlu0 %2747  ;;  %v332_v46 = vsel %vm274_vm2, %v3239_v45, 0.0 }
 0x29e   :  { %v2749_v43 = vunpack.i.l.bf16 %v2748_v42  ;;  %v2750_v38 = vunpack.i.h.bf16 %v2748_v42 }
 0x29f   :  { %345 = vadd.xlane.f32.xlu2 %v344_v44 }
 0x2a0   :  { %528 = vmatpush.msra.mxu2 %v2749_v43 }
 0x2a2   :  { %529 = vmatpush.msra.mxu2 %v2750_v38 }
 0x2a7   :  { %333 = vadd.xlane.f32.xlu2 %v332_v46 }
 0x2a9   :  { %2757 = vrot.lane.b32.xlu0 %v2756_v47, %s3002_s2 }
 0x2b0   :  { %2752 = vrot.lane.b32.xlu1 %v2751_v48, %s3002_s2 }
 0x2bf   :  { %2762 = vrot.lane.b32.xlu2 %v2761_v49, %s3002_s2 }
 0x2ee   :  { %v331_v50 = vpop.xlane.xlu0 %330 }
 0x2ef   :  { %2865 = vrcp.f32 %v331_v50  ;;  %v388_v55 = vand.u32 2147483648, %v331_v50  ;;  %v386_v10 = vand.u32 2147483647, %v331_v50  ;;  %vm382_vm4 = vweird.f32 %v331_v50 }
 0x2f0   :  { %2867 = vrcp.f32 %v325_v53 }
 0x2f1   :  { %v389_v15 = vor.u32 1.1754944e-38, %v388_v55  ;;  %vm387_vm6 = vcmp.eq.f32.partialorder %v386_v10, 8.507059e+37 }
 0x2f5   :  { %v2866_v51 = vpop.eup %2865 }
 0x2f6   :  { %v378_v52 = vmul.f32 %v2866_v51, %v331_v50  ;;  %vm383_vm3 = vweird.f32 %v2866_v51  ;;  %v2868_v14 = vpop.eup %2867 }
 0x2f7   :  { %vm384_vm5 = vmor %vm382_vm4, %vm383_vm3  ;;  %v348_v59 = vmul.f32 %v2868_v14, %v325_v53  ;;  %vm353_vm7 = vweird.f32 %v2868_v14 }
 0x2f8   :  { %v379_v54 = vsub.f32 1.0, %v378_v52  ;;  %vm354_vm9 = vmor %vm352_vm8, %vm353_vm7 }
 0x2f9   :  { %v349_v60 = vsub.f32 1.0, %v348_v59 }
 0x2fa   :  { %v380_v8 = vmul.f32 %v2866_v51, %v379_v54 }
 0x2fb   :  { %v350_v1 = vmul.f32 %v2868_v14, %v349_v60 }
 0x2fc   :  { %v381_v56 = vadd.f32 %v2866_v51, %v380_v8 }
 0x2fd   :  { %v351_v6 = vadd.f32 %v2868_v14, %v350_v1 }
 0x2fe   :  { %v385_v16 = vsel %vm384_vm5, %v2866_v51, %v381_v56 }
 0x2ff   :  { %v390_v11 = vsel %vm387_vm6, %v389_v15, %v385_v16  ;;  %v355_v22 = vsel %vm354_vm9, %v2868_v14, %v351_v6 }
 0x300   :  { %v391_v57 = vmul.f32 %v3214_v7, %v390_v11  ;;  %v360_v30 = vsel %vm357_vm10, %v359_v24, %v355_v22 }
 0x301   :  { %v361_v40 = vmul.f32 %v3206_v61, %v360_v30 }
 0x302   :  { %2615 = vmatmul.msk.f32.vlgmr.msra.gmra.mxu2 %vm274_vm2, %v391_v57  ;;  %v343_v58 = vpop.xlane.xlu2 %342 }
 0x303   :  { %2869 = vrcp.f32 %v343_v58  ;;  %v446_v28 = vand.u32 2147483647, %v343_v58  ;;  %v448_v29 = vand.u32 2147483648, %v343_v58  ;;  %vm442_vm12 = vweird.f32 %v343_v58 }
 0x305   :  { %vm3293_vm14 = vcmp.eq.f32.partialorder %v446_v28, 8.507059e+37  ;;  %v449_v44 = vor.u32 1.1754944e-38, %v448_v29 }
 0x308   :  { %v3261_v3 = vpop.xlane.xlu0 %339 }
 0x309   :  { %v3254_v62 = vpop.eup %2869  ;;  %vm427_vm4 = vweird.f32 %v3261_v3  ;;  %v433_v10 = vand.u32 2147483648, %v3261_v3  ;;  %v431_v14 = vand.u32 2147483647, %v3261_v3 }
 0x30a   :  { %v3256_v63 = vpop.xlane.xlu2 %327  ;;  %v3258_v0 = vpop.xlane.xlu1 %336  ;;  %v438_v2 = vmul.f32 %v3254_v62, %v343_v58  ;;  %vm443_vm11 = vweird.f32 %v3254_v62 }
 0x30b   :  { %2871 = vrcp.f32 %v3256_v63  ;;  %vm3289_vm13 = vmor %vm442_vm12, %vm443_vm11  ;;  %v373_v38 = vand.u32 2147483648, %v3256_v63  ;;  %v416_v49 = vand.u32 2147483647, %v3258_v0  ;;  %v418_v54 = vand.u32 2147483648, %v3258_v0 }
 0x30c   :  { %2873 = vrcp.f32 %v3258_v0  ;;  %v439_v7 = vsub.f32 1.0, %v438_v2  ;;  %v371_v8 = vand.u32 2147483647, %v3256_v63  ;;  %vm412_vm5 = vweird.f32 %v3258_v0 }
 0x30d   :  { %2875 = vrcp.f32 %v3261_v3  ;;  %vm367_vm6 = vweird.f32 %v3256_v63  ;;  %v374_v57 = vor.u32 1.1754944e-38, %v373_v38  ;;  %vm3330_vm8 = vcmp.eq.f32.partialorder %v416_v49, 8.507059e+37 }
 0x30e   :  { %v440_v12 = vmul.f32 %v3254_v62, %v439_v7  ;;  %vm372_vm10 = vcmp.eq.f32.partialorder %v371_v8, 8.507059e+37  ;;  %v868_v8 = vld [vmem:[%s4205_s8 + $0x18] sm:$0xff] }
 0x310   :  { %v441_v33 = vadd.f32 %v3254_v62, %v440_v12 }
 0x311   :  { %v3266_v17 = vpop.eup %2871 }
 0x312   :  { %v3268_v19 = vpop.eup %2873  ;;  %v363_v20 = vmul.f32 %v3266_v17, %v3256_v63  ;;  %v3272_v21 = vpop.xlane.xlu2 %345  ;;  %v445_v61 = vsel %vm3289_vm13, %v3254_v62, %v441_v33  ;;  %vm368_vm3 = vweird.f32 %v3266_v17 }
 0x313   :  { %v408_v13 = vmul.f32 %v3268_v19, %v3258_v0  ;;  %2877 = vrcp.f32 %v3272_v21  ;;  %v3278_v23 = vpop.eup %2875  ;;  %vm413_vm15 = vweird.f32 %v3268_v19  ;;  %v450_v15 = vsel %vm3293_vm14, %v449_v44, %v445_v61  ;;  %vm3337_vm9 = vmor %vm367_vm6, %vm368_vm3  ;;  %v100_v61 = vld [vmem:[%s4203_s6 + $0x8] sm:$0xff] }
 0x314   :  { %v364_v25 = vsub.f32 1.0, %v363_v20  ;;  %v423_v34 = vmul.f32 %v3278_v23, %v3261_v3  ;;  %vm3322_vm7 = vmor %vm412_vm5, %vm413_vm15  ;;  %v419_v0 = vor.u32 1.1754944e-38, %v418_v54  ;;  %vm428_vm11 = vweird.f32 %v3278_v23  ;;  %657 = vmatpush.msrb.mxu2 %v100_v61 }
 0x315   :  { %v409_v27 = vsub.f32 1.0, %v408_v13  ;;  %vm457_vm12 = vweird.f32 %v3272_v21  ;;  %v463_v2 = vand.u32 2147483648, %v3272_v21  ;;  %v451_v18 = vmul.f32 %v3218_v26, %v450_v15  ;;  %vm3363_vm15 = vmor %vm427_vm4, %vm428_vm11  ;;  %v865_v15 = vld [vmem:[%s4205_s8] sm:$0xff] }
 0x316   :  { %v365_v39 = vmul.f32 %v3266_v17, %v364_v25  ;;  %v424_v48 = vsub.f32 1.0, %v423_v34  ;;  %v461_v26 = vand.u32 2147483647, %v3272_v21  ;;  %897 = vmatpush.msra.mxu2 %v868_v8  ;;  %v834_v8 = vld [vmem:[%s4204_s7 + $0x18] sm:$0xff] }
 0x317   :  { %v410_v36 = vmul.f32 %v3268_v19, %v409_v27 }
 0x318   :  { %v366_v55 = vadd.f32 %v3266_v17, %v365_v39  ;;  %v425_v16 = vmul.f32 %v3278_v23, %v424_v48  ;;  %v99_v48 = vld [vmem:[%s4203_s6] sm:$0xff] }
 0x319   :  { %v3285_v37 = vpop.eup %2877  ;;  %v411_v51 = vadd.f32 %v3268_v19, %v410_v36 }
 0x31a   :  { %v453_v46 = vmul.f32 %v3285_v37, %v3272_v21  ;;  %v3300_v47 = vpop.xlane.xlu2 %333  ;;  %v370_v1 = vsel %vm3337_vm9, %v3266_v17, %v366_v55  ;;  %v426_v17 = vadd.f32 %v3278_v23, %v425_v16  ;;  %vm458_vm13 = vweird.f32 %v3285_v37  ;;  %v53_v16 = vld [vmem:[%s4198_s1] sm:$0xff] }
 0x31b   :  { %2879 = vrcp.f32 %v3300_v47  ;;  %v2758_v50 = vpop.permute.xlu0 %2757  ;;  %v415_v58 = vsel %vm3322_vm7, %v3268_v19, %v411_v51  ;;  %v375_v22 = vsel %vm372_vm10, %v374_v57, %v370_v1  ;;  %v403_v25 = vand.u32 2147483648, %v3300_v47  ;;  %vm3372_vm3 = vmor %vm457_vm12, %vm458_vm13 }
 0x31c   :  { %v454_v52 = vsub.f32 1.0, %v453_v46  ;;  %v2759_v53 = vunpack.i.l.bf16 %v2758_v50  ;;  %v2760_v56 = vunpack.i.h.bf16 %v2758_v50  ;;  %v420_v19 = vsel %vm3330_vm8, %v419_v0, %v415_v58  ;;  %v54_v0 = vld [vmem:[%s4198_s1 + $0x8] sm:$0xff] }
 0x31d   :  { %v421_v30 = vmul.f32 %v3228_v35, %v420_v19  ;;  %v401_v33 = vand.u32 2147483647, %v3300_v47  ;;  %v376_v36 = vmul.f32 %v3222_v31, %v375_v22  ;;  %vm397_vm5 = vweird.f32 %v3300_v47 }
 0x31e   :  { %493 = vmatpush.msrb.mxu1 %v2759_v53  ;;  %v455_v60 = vmul.f32 %v3285_v37, %v454_v52  ;;  %v430_v39 = vsel %vm3363_vm15, %v3278_v23, %v426_v17  ;;  %v434_v21 = vor.u32 1.1754944e-38, %v433_v10  ;;  %v404_v42 = vor.u32 1.1754944e-38, %v403_v25  ;;  %v867_v10 = vld [vmem:[%s4205_s8 + $0x10] sm:$0xff] }
 0x31f   :  { %vm402_vm6 = vcmp.eq.f32.partialorder %v401_v33, 8.507059e+37  ;;  %vm432_vm7 = vcmp.eq.f32.partialorder %v431_v14, 8.507059e+37  ;;  %vm462_vm8 = vcmp.eq.f32.partialorder %v461_v26, 8.507059e+37  ;;  %898 = vmatpush.msra.mxu2 %v867_v10  ;;  %v833_v10 = vld [vmem:[%s4204_s7 + $0x10] sm:$0xff]  ;;  %vm1014_vm10 = vcmask 31744  }
 0x320   :  { %494 = vmatpush.msrb.mxu1 %v2760_v56  ;;  %v456_v24 = vadd.f32 %v3285_v37, %v455_v60  ;;  %v435_v38 = vsel %vm432_vm7, %v434_v21, %v430_v39  ;;  %v866_v56 = vld [vmem:[%s4205_s8 + $0x8] sm:$0xff]  ;;  %v3434_v60 = vld [vmem:[%s4211_s14] sm:$0xff]  ;;  %s3009_s8 = smov 128  }
 0x321   :  { %v2880_v63 = vpop.eup %2879  ;;  %2613 = vmatmul.msk.f32.vlgmr.msrb.gmra.mxu1 %vm274_vm2, %v361_v40  ;;  %v464_v40 = vor.u32 1.1754944e-38, %v463_v2  ;;  %899 = vmatpush.msra.mxu2 %v866_v56  ;;  %v832_v56 = vld [vmem:[%s4204_s7 + $0x8] sm:$0xff] }
 0x322   :  { %v393_v6 = vmul.f32 %v2880_v63, %v3300_v47  ;;  %v2763_v7 = vpop.permute.xlu2 %2762  ;;  %v2753_v9 = vpop.permute.xlu1 %2752  ;;  %vm398_vm14 = vweird.f32 %v2880_v63  ;;  %v460_v31 = vsel %vm3372_vm3, %v3285_v37, %v456_v24  ;;  %v436_v37 = vmul.f32 %v3224_v32, %v435_v38  ;;  %628 = vmatpush.msra.mxu1 %v99_v48  ;;  %v102_v32 = vld [vmem:[%s4203_s6 + $0x18] sm:$0xff] }
 0x323   :  { %v2764_v20 = vunpack.i.l.bf16 %v2763_v7  ;;  %v2754_v12 = vunpack.i.l.bf16 %v2753_v9  ;;  %v2765_v27 = vunpack.i.h.bf16 %v2763_v7  ;;  %v2755_v28 = vunpack.i.h.bf16 %v2753_v9  ;;  %vm399_vm4 = vmor %vm397_vm5, %vm398_vm14  ;;  %900 = vmatpush.msra.mxu2 %v865_v15 }
 0x324   :  { %v394_v13 = vsub.f32 1.0, %v393_v6  ;;  %v465_v46 = vsel %vm462_vm8, %v464_v40, %v460_v31  ;;  %v737_v6 = vperm.slane %v3434_v60, 6  ;;  %854 = vmatpush.msrb.mxu1 %v834_v8 }
 0x325   :  { %563 = vmatpush.msra.mxu3 %v2754_v12  ;;  %598 = vmatpush.msra.mxu0 %v2764_v20  ;;  %v466_v47 = vmul.f32 %v3235_v41, %v465_v46  ;;  %v101_v41 = vld [vmem:[%s4203_s6 + $0x10] sm:$0xff] }
 0x326   :  { %v395_v29 = vmul.f32 %v2880_v63, %v394_v13  ;;  %855 = vmatpush.msrb.mxu1 %v833_v10 }
 0x327   :  { %564 = vmatpush.msra.mxu3 %v2755_v28  ;;  %599 = vmatpush.msra.mxu0 %v2765_v27  ;;  %v55_v27 = vld [vmem:[%s4198_s1 + $0x10] sm:$0xff] }
 0x328   :  { %2617 = vmatmul.msk.f32.vlgmr.msra.gmra.mxu3 %vm274_vm2, %v421_v30  ;;  %2619 = vmatmul.msk.f32.vlgmr.msra.gmra.mxu0 %vm274_vm2, %v451_v18  ;;  %v396_v3 = vadd.f32 %v2880_v63, %v395_v29 }
 0x329   :  { %2614 = vmatmul.msk.f32.gmra.mxu1 %vm274_vm2, %v376_v36  ;;  %715 = vmatpush.msrb.mxu0 %v102_v32 }
 0x32a   :  { %v400_v43 = vsel %vm399_vm4, %v2880_v63, %v396_v3  ;;  %686 = vmatpush.msrb.mxu3 %v101_v41  ;;  %v3003_v3 = vmov 32.0   ;;  %856 = vmatpush.msrb.mxu1 %v832_v56 }
 0x32b   :  { %v405_v44 = vsel %vm402_vm6, %v404_v42, %v400_v43  ;;  %2881 = vrcp.f32 %v3003_v3 }
 0x32c   :  { %v406_v23 = vmul.f32 %v3239_v45, %v405_v44 }
 0x32e   :  { %2616 = vmatmul.msk.f32.gmra.mxu2 %vm274_vm2, %v406_v23 }
 0x330   :  { %2618 = vmatmul.msk.f32.gmra.mxu3 %vm274_vm2, %v436_v37  ;;  %2620 = vmatmul.msk.f32.gmra.mxu0 %vm274_vm2, %v466_v47 }
 0x331   :  { %v2882_v39 = vpop.eup %2881 }
 0x332   :  { %v749_v31 = vmul.f32 32.0, %v2882_v39 }
 0x334   :  { %v750_v21 = vsub.f32 1.0, %v749_v31  ;;  %v793_v31 = vperm.slane %v3434_v60, 0 }
 0x336   :  { %v751_v40 = vmul.f32 %v2882_v39, %v750_v21 }
 0x338   :  { %v752_v42 = vadd.f32 %v2882_v39, %v751_v40 }
 0x385   :  { %v531_v45 = vpop.f32.mrf.mxu2 }
 0x386   :  { %2623 = vmatmul.msk.f32.vlgmr.msrb.gmra.mxu2 %vm121_vm1, %v531_v45 }
 0x39e   :  { %v496_v49 = vpop.f32.mrf.mxu1 }
 0x39f   :  { %2621 = vmatmul.msk.f32.vlgmr.msra.gmra.mxu1 %vm121_vm1, %v496_v49 }
 0x3a5   :  { %v601_v50 = vpop.f32.mrf.mxu0 }
 0x3a6   :  { %v499_v51 = vpop.f32.mrf.mxu1  ;;  %2627 = vmatmul.msk.f32.vlgmr.msrb.gmra.mxu0 %vm121_vm1, %v601_v50  ;;  %v2847_v50 = vld [vmem:[%s4206_s9] ss:$0 sm:$0xff]  ;;  %s3005_s9 = smov 124  }
 0x3a7   :  { %2622 = vmatmul.msk.f32.gmra.mxu1 %vm121_vm1, %v499_v51 }
 0x3ab   :  { %v566_v52 = vpop.f32.mrf.mxu3 }
 0x3ac   :  { %2625 = vmatmul.msk.f32.vlgmr.msrb.gmra.mxu3 %vm121_vm1, %v566_v52 }
 0x3ad   :  { %v604_v53 = vpop.f32.mrf.mxu0 }
 0x3ae   :  { %2628 = vmatmul.msk.f32.gmra.mxu0 %vm121_vm1, %v604_v53 }
 0x3b1   :  { %v534_v54 = vpop.f32.mrf.mxu2 }
 0x3b2   :  { %2624 = vmatmul.msk.f32.gmra.mxu2 %vm121_vm1, %v534_v54 }
 0x3b3   :  { %v569_v55 = vpop.f32.mrf.mxu3 }
 0x3b4   :  { %2626 = vmatmul.msk.f32.gmra.mxu3 %vm121_vm1, %v569_v55  ;;  %vm753_vm1 = vweird.f32 %v2882_v39 }
 0x3b5   :  { %v3459_v43 = vsel %vm753_vm1, %v2882_v39, %v752_v42 }
 0x3ba   :  { %2631 = vmatmul.msk.f32.vlgmr.msra.gmra.mxu2 %vm67_vm0, %v53_v16  ;;  %v831_v16 = vld [vmem:[%s4204_s7] sm:$0xff]  ;;  %s3010_s7 = smov 8  }
 0x3bb   :  { %857 = vmatpush.msrb.mxu1 %v831_v16 }
 0x3c2   :  { %2632 = vmatmul.msk.f32.gmra.mxu2 %vm67_vm0, %v54_v0 }
 0x3ca   :  { %2633 = vmatmul.msk.f32.gmra.mxu2 %vm67_vm0, %v55_v27 }
 0x409   :  { %v659_v14 = vpop.f32.mrf.mxu2 }
 0x40a   :  { %v724_v59 = vsel %vm67_vm0, %v659_v14, 0.0 }
 0x41c   :  { %v630_v11 = vpop.f32.mrf.mxu1 }
 0x41d   :  { %v723_v57 = vsel %vm67_vm0, %v630_v11, 0.0 }
 0x41e   :  { %v725_v62 = vadd.f32 %v724_v59, %v723_v57 }
 0x423   :  { %v717_v58 = vpop.f32.mrf.mxu0 }
 0x424   :  { %v728_v7 = vsel %vm67_vm0, %v717_v58, 0.0  ;;  %v633_v9 = vpop.f32.mrf.mxu1 }
 0x425   :  { %v730_v12 = vsel %vm67_vm0, %v633_v9, 0.0 }
 0x42b   :  { %v720_v13 = vpop.f32.mrf.mxu0 }
 0x42c   :  { %v735_v30 = vsel %vm67_vm0, %v720_v13, 0.0 }
 0x42f   :  { %v688_v63 = vpop.f32.mrf.mxu3 }
 0x430   :  { %v726_v1 = vsel %vm67_vm0, %v688_v63, 0.0 }
 0x431   :  { %v727_v2 = vadd.f32 %v726_v1, %v725_v62 }
 0x433   :  { %v729_v18 = vadd.f32 %v728_v7, %v727_v2 }
 0x435   :  { %v662_v19 = vpop.f32.mrf.mxu2  ;;  %v738_v20 = vadd.f32 %v737_v6, %v729_v18 }
 0x436   :  { %v731_v17 = vsel %vm67_vm0, %v662_v19, 0.0 }
 0x437   :  { %v732_v22 = vadd.f32 %v731_v17, %v730_v12  ;;  %v691_v24 = vpop.f32.mrf.mxu3  ;;  %v740_v25 = vadd.f32 %v738_v20, %v3106_v4  ;;  %v56_v4 = vld [vmem:[%s4198_s1 + $0x18] sm:$0xff] }
 0x438   :  { %v733_v28 = vsel %vm67_vm0, %v691_v24, 0.0  ;;  %2634 = vmatmul.msk.f32.gmra.mxu2 %vm67_vm0, %v56_v4 }
 0x439   :  { %v734_v26 = vadd.f32 %v733_v28, %v732_v22  ;;  %v742_v29 = vsel %vm67_vm0, %v740_v25, 0.0 }
 0x43a   :  { %743 = vadd.xlane.f32.xlu1 %v742_v29 }
 0x43b   :  { %v736_v33 = vadd.f32 %v735_v30, %v734_v26 }
 0x43d   :  { %v739_v34 = vadd.f32 %v737_v6, %v736_v33  ;;  %v902_v44 = vpop.f32.mrf.mxu2 }
 0x43e   :  { %v3494_v55 = vadd.f32 %v2847_v50, %v902_v44 }
 0x43f   :  { %v741_v36 = vadd.f32 %v739_v34, %v3111_v5 }
 0x441   :  { %v745_v35 = vsel %vm67_vm0, %v741_v36, 0.0 }
 0x442   :  { %746 = vadd.xlane.f32.xlu0 %v745_v35 }
 0x445   :  { %v905_v61 = vpop.f32.mrf.mxu2 }
 0x446   :  { %v3486_v54 = vadd.f32 %v2847_v50, %v905_v61  ;;  %v828_v61 = vperm.slane %v3434_v60, 1 }
 0x44d   :  { %v908_v49 = vpop.f32.mrf.mxu2 }
 0x44e   :  { %v3480_v53 = vadd.f32 %v2847_v50, %v908_v49 }
 0x4ad   :  { %v744_v5 = vpop.xlane.xlu1 %743 }
 0x4ae   :  { %v755_v38 = vmul.f32 %v3459_v43, %v744_v5 }
 0x4b0   :  { %v3462_v46 = vsub.f32 %v740_v25, %v755_v38 }
 0x4b2   :  { %v759_v23 = vmul.f32 %v3462_v46, %v3462_v46  ;;  %v794_v38 = vmul.f32 %v793_v31, %v3462_v46 }
 0x4b4   :  { %v761_v37 = vsel %vm67_vm0, %v759_v23, 0.0 }
 0x4b5   :  { %762 = vadd.xlane.f32.xlu2 %v761_v37  ;;  %v747_v47 = vpop.xlane.xlu0 %746 }
 0x4b6   :  { %v756_v48 = vmul.f32 %v3459_v43, %v747_v47 }
 0x4b8   :  { %v3468_v45 = vsub.f32 %v741_v36, %v756_v48 }
 0x4ba   :  { %v760_v32 = vmul.f32 %v3468_v45, %v3468_v45 }
 0x4bb   :  { %v911_v51 = vpop.f32.mrf.mxu2 }
 0x4bc   :  { %v764_v41 = vsel %vm67_vm0, %v760_v32, 0.0  ;;  %v3476_v52 = vadd.f32 %v2847_v50, %v911_v51 }
 0x4bd   :  { %765 = vadd.xlane.f32.xlu1 %v764_v41 }
 0x4be   :  { %980 = vrot.lane.b32.xlu0 %v3476_v52, %s3004_s30  ;;  %2635 = vmatpush.xpose.msk.msra.mxu3 %vm1014_vm10, %v3476_v52 }
 0x4c2   :  { %2636 = vmatpush.xpose.msk.msra.mxu3 %vm1014_vm10, %v3480_v53 }
 0x4c6   :  { %970 = vrot.lane.b32.xlu0 %v3480_v53, %s2998_s16  ;;  %2637 = vmatpush.xpose.msk.msra.mxu3 %vm1014_vm10, %v3486_v54 }
 0x4ca   :  { %2638 = vmatpush.xpose.msk.msra.mxu3 %vm1014_vm10, %v3494_v55 }
 0x4cd   :  { %978 = vrot.lane.b32.xlu2 %v3480_v53, %s3004_s30 }
 0x4ce   :  { %976 = vrot.lane.b32.xlu0 %v3486_v54, %s3004_s30 }
 0x4d5   :  { %1004 = vrot.lane.b32.xlu2 %v3476_v52, %s2999_s0 }
 0x4d6   :  { %972 = vrot.lane.b32.xlu1 %v3476_v52, %s2998_s16  ;;  %968 = vrot.lane.b32.xlu0 %v3486_v54, %s2998_s16 }
 0x4dd   :  { %966 = vrot.lane.b32.xlu2 %v3494_v55, %s2998_s16 }
 0x4de   :  { %964 = vrot.lane.b32.xlu1 %v3476_v52, %s3005_s9  ;;  %1012 = vrot.lane.b32.xlu0 %v3476_v52, %s3006_s18 }
 0x4e5   :  { %1000 = vrot.lane.b32.xlu2 %v3486_v54, %s2999_s0 }
 0x4e6   :  { %974 = vrot.lane.b32.xlu1 %v3494_v55, %s3004_s30  ;;  %960 = vrot.lane.b32.xlu0 %v3486_v54, %s3005_s9 }
 0x4ed   :  { %1008 = vrot.lane.b32.xlu2 %v3486_v54, %s3006_s18 }
 0x4ee   :  { %962 = vrot.lane.b32.xlu1 %v3480_v53, %s3005_s9  ;;  %998 = vrot.lane.b32.xlu0 %v3494_v55, %s2999_s0 }
 0x4f5   :  { %986 = vrot.lane.b32.xlu2 %v3480_v53, %s3000_s17 }
 0x4f6   :  { %1002 = vrot.lane.b32.xlu1 %v3480_v53, %s2999_s0  ;;  %988 = vrot.lane.b32.xlu0 %v3476_v52, %s3000_s17 }
 0x4fd   :  { %984 = vrot.lane.b32.xlu2 %v3486_v54, %s3000_s17 }
 0x4fe   :  { %1010 = vrot.lane.b32.xlu1 %v3480_v53, %s3006_s18  ;;  %996 = vrot.lane.b32.xlu0 %v3476_v52, %s3007_s19 }
 0x506   :  { %958 = vrot.lane.b32.xlu1 %v3494_v55, %s3005_s9  ;;  %994 = vrot.lane.b32.xlu0 %v3480_v53, %s3007_s19 }
 0x50e   :  { %1006 = vrot.lane.b32.xlu1 %v3494_v55, %s3006_s18 }
 0x516   :  { %992 = vrot.lane.b32.xlu1 %v3486_v54, %s3007_s19 }
 0x528   :  { %v763_v15 = vpop.xlane.xlu2 %762 }
 0x529   :  { %v767_v11 = vmul.f32 0.032258064, %v763_v15 }
 0x52b   :  { %2883 = vrsqrt.f32 %v767_v11  ;;  %vm776_vm2 = vcmp.eq.f32.partialorder %v767_v11, inf  ;;  %v779_v18 = vand.u32 2147483648, %v767_v11  ;;  %vm778_vm9 = vcmp.eq.f32.partialorder %v767_v11, 0.0 }
 0x530   :  { %v766_v14 = vpop.xlane.xlu1 %765  ;;  %v3550_v22 = vpop.permute.xlu0 %980 }
 0x531   :  { %v2884_v57 = vpop.eup %2883  ;;  %v768_v58 = vmul.f32 0.032258064, %v766_v14  ;;  %v3552_v24 = vpop.permute.xlu2 %978  ;;  %2653 = vmatpush.xpose.msk.msrb.mxu3 %vm1014_vm10, %v3550_v22 }
 0x532   :  { %v770_v59 = vmul.f32 %v2884_v57, %v767_v11 }
 0x533   :  { %2885 = vrsqrt.f32 %v768_v58  ;;  %vm788_vm11 = vcmp.eq.f32.partialorder %v768_v58, inf  ;;  %v791_v28 = vand.u32 2147483648, %v768_v58  ;;  %vm790_vm12 = vcmp.eq.f32.partialorder %v768_v58, 0.0 }
 0x534   :  { %v771_v62 = vmul.f32 %v2884_v57, %v770_v59 }
 0x535   :  { %2654 = vmatpush.xpose.msk.msrb.mxu3 %vm1014_vm10, %v3552_v24 }
 0x536   :  { %v772_v63 = vmul.f32 0.5, %v771_v62 }
 0x538   :  { %v773_v0 = vsub.f32 1.5, %v772_v63  ;;  %v3560_v4 = vpop.permute.xlu0 %970 }
 0x539   :  { %v2886_v1 = vpop.eup %2885  ;;  %v3562_v35 = vpop.permute.xlu2 %1004 }
 0x53a   :  { %v774_v2 = vmul.f32 %v2884_v57, %v773_v0  ;;  %v782_v6 = vmul.f32 %v2886_v1, %v768_v58  ;;  %2671 = vmatpush.xpose.msk.msrb.mxu2 %vm1014_vm10, %v3562_v35  ;;  %v795_v57 = vmul.f32 %v793_v31, %v3468_v45 }
 0x53c   :  { %v775_v7 = vmul.f32 %v774_v2, %v767_v11  ;;  %v783_v9 = vmul.f32 %v2886_v1, %v782_v6 }
 0x53e   :  { %v777_v19 = vsel %vm776_vm2, %v767_v11, %v775_v7  ;;  %v784_v20 = vmul.f32 0.5, %v783_v9 }
 0x53f   :  { %v780_v12 = vsel %vm778_vm9, %v779_v18, %v777_v19 }
 0x540   :  { %v796_v17 = vadd.f32 1e-06, %v780_v12  ;;  %v785_v13 = vsub.f32 1.5, %v784_v20  ;;  %v3581_v32 = vpop.permute.xlu0 %976 }
 0x541   :  { %v3583_v41 = vpop.permute.xlu2 %966  ;;  %2655 = vmatpush.xpose.msk.msrb.mxu3 %vm1014_vm10, %v3581_v32 }
 0x542   :  { %2887 = vrcp.f32 %v796_v17  ;;  %v786_v25 = vmul.f32 %v2886_v1, %v785_v13  ;;  %v809_v21 = vand.u32 2147483648, %v796_v17  ;;  %v807_v42 = vand.u32 2147483647, %v796_v17 }
 0x543   :  { %vm803_vm14 = vweird.f32 %v796_v17  ;;  %v2776_v49 = vpack.i.bf16 %v3583_v41, %v3552_v24 }
 0x544   :  { %v787_v27 = vmul.f32 %v786_v25, %v768_v58  ;;  %v810_v23 = vor.u32 1.1754944e-38, %v809_v21  ;;  %vm808_vm3 = vcmp.eq.f32.partialorder %v807_v42, 8.507059e+37  ;;  %v2781_v42 = vpack.i.bf16 %v3476_v52, %v3581_v32 }
 0x546   :  { %v789_v26 = vsel %vm788_vm11, %v768_v58, %v787_v27 }
 0x547   :  { %v792_v29 = vsel %vm790_vm12, %v791_v28, %v789_v26 }
 0x548   :  { %v2888_v30 = vpop.eup %2887  ;;  %v797_v33 = vadd.f32 1e-06, %v792_v29  ;;  %v3556_v34 = vpop.permute.xlu1 %972 }
 0x549   :  { %v799_v36 = vmul.f32 %v2888_v30, %v796_v17  ;;  %2647 = vmatpush.xpose.msk.msra.mxu1 %vm1014_vm10, %v3556_v34  ;;  %v2766_v39 = vpack.i.bf16 %v3560_v4, %v3556_v34  ;;  %vm804_vm13 = vweird.f32 %v2888_v30  ;;  %v3600_v59 = vpop.permute.xlu0 %968  ;;  %v3627_v18 = vpop.permute.xlu2 %1000 }
 0x54a   :  { %2889 = vrcp.f32 %v797_v33  ;;  %vm805_vm15 = vmor %vm803_vm14, %vm804_vm13  ;;  %v824_v8 = vand.u32 2147483648, %v797_v33  ;;  %v822_v15 = vand.u32 2147483647, %v797_v33  ;;  %vm818_vm4 = vweird.f32 %v797_v33 }
 0x54b   :  { %v800_v3 = vsub.f32 1.0, %v799_v36  ;;  %v2771_v63 = vpack.i.bf16 %v3600_v59, %v3550_v22  ;;  %v835_v36 = vperm.slane %v3434_v60, 7 }
 0x54c   :  { %v825_v11 = vor.u32 1.1754944e-38, %v824_v8  ;;  %vm823_vm7 = vcmp.eq.f32.partialorder %v822_v15, 8.507059e+37 }
 0x54d   :  { %v801_v40 = vmul.f32 %v2888_v30, %v800_v3  ;;  %2648 = vmatpush.xpose.msk.msra.mxu1 %vm1014_vm10, %v3560_v4 }
 0x54f   :  { %v802_v5 = vadd.f32 %v2888_v30, %v801_v40 }
 0x550   :  { %v2890_v44 = vpop.eup %2889  ;;  %v3578_v37 = vpop.permute.xlu1 %964 }
 0x551   :  { %v806_v47 = vsel %vm805_vm15, %v2888_v30, %v802_v5  ;;  %v814_v48 = vmul.f32 %v2890_v44, %v797_v33  ;;  %2641 = vmatpush.xpose.msk.msra.mxu0 %vm1014_vm10, %v3578_v37  ;;  %vm819_vm5 = vweird.f32 %v2890_v44  ;;  %2649 = vmatpush.xpose.msk.msra.mxu1 %vm1014_vm10, %v3600_v59  ;;  %v3616_v2 = vpop.permute.xlu0 %1012  ;;  %v1009_v12 = vpop.permute.xlu2 %1008  ;;  %v2791_v52 = vpack.i.bf16 %v3486_v54, %v3578_v37 }
 0x552   :  { %v811_v46 = vsel %vm808_vm3, %v810_v23, %v806_v47  ;;  %vm820_vm6 = vmor %vm818_vm4, %vm819_vm5 }
 0x553   :  { %v812_v50 = vmul.f32 %v811_v46, %v794_v38  ;;  %v815_v51 = vsub.f32 1.0, %v814_v48 }
 0x555   :  { %v3591_v10 = vadd.f32 %v828_v61, %v812_v50  ;;  %v816_v56 = vmul.f32 %v2890_v44, %v815_v51  ;;  %2650 = vmatpush.xpose.msk.msra.mxu1 %vm1014_vm10, %v3583_v41  ;;  %v3740_v41 = vld [vmem:[%s4200_s3] sm:$0xff] }
 0x557   :  { %2629 = vmatmul.msk.f32.vlgmr.msrb.gmra.mxu1 %vm67_vm0, %v3591_v10  ;;  %v817_v16 = vadd.f32 %v2890_v44, %v816_v56 }
 0x558   :  { %v3597_v14 = vpop.permute.xlu1 %974 }
 0x559   :  { %v821_v58 = vsel %vm820_vm6, %v2890_v44, %v817_v16  ;;  %2656 = vmatpush.xpose.msk.msrb.mxu3 %vm1014_vm10, %v3597_v14  ;;  %v961_v9 = vpop.permute.xlu0 %960  ;;  %v3637_v13 = vpop.permute.xlu2 %986  ;;  %v2786_v34 = vpack.i.bf16 %v3480_v53, %v3597_v14 }
 0x55a   :  { %v826_v62 = vsel %vm823_vm7, %v825_v11, %v821_v58  ;;  %v3757_v11 = vld [vmem:[%s4200_s3 + $0x8] sm:$0xff] }
 0x55b   :  { %v827_v0 = vmul.f32 %v826_v62, %v795_v57 }
 0x55d   :  { %v3608_v1 = vadd.f32 %v828_v61, %v827_v0 }
 0x55f   :  { %2630 = vmatmul.msk.f32.gmra.mxu1 %vm67_vm0, %v3608_v1 }
 0x560   :  { %v3614_v45 = vpop.permute.xlu1 %962 }
 0x561   :  { %2642 = vmatpush.xpose.msk.msra.mxu0 %vm1014_vm10, %v3614_v45  ;;  %v3631_v19 = vpop.permute.xlu0 %998  ;;  %v3643_v28 = vpop.permute.xlu2 %984  ;;  %v2796_v24 = vpack.i.bf16 %v3494_v55, %v3614_v45 }
 0x565   :  { %2643 = vmatpush.xpose.msk.msra.mxu0 %vm1014_vm10, %v961_v9 }
 0x568   :  { %v3620_v6 = vpop.permute.xlu1 %1002 }
 0x569   :  { %v2806_v7 = vpack.i.bf16 %v3620_v6, %v3562_v35  ;;  %2672 = vmatpush.xpose.msk.msrb.mxu2 %vm1014_vm10, %v3620_v6  ;;  %v989_v25 = vpop.permute.xlu0 %988 }
 0x56a   :  { %v2821_v27 = vpack.i.bf16 %v989_v25, %v1009_v12 }
 0x56d   :  { %2673 = vmatpush.xpose.msk.msrb.mxu2 %vm1014_vm10, %v3627_v18 }
 0x570   :  { %v3635_v20 = vpop.permute.xlu1 %1010 }
 0x571   :  { %2674 = vmatpush.xpose.msk.msrb.mxu2 %vm1014_vm10, %v3631_v19  ;;  %v3645_v26 = vpop.permute.xlu0 %996  ;;  %v2816_v53 = vpack.i.bf16 %v3631_v19, %v3635_v20 }
 0x572   :  { %2665 = vmatpush.xpose.msk.msrb.mxu1 %vm1014_vm10, %v3645_v26 }
 0x578   :  { %v959_v17 = vpop.permute.xlu1 %958 }
 0x579   :  { %2644 = vmatpush.xpose.msk.msra.mxu0 %vm1014_vm10, %v959_v17  ;;  %v3655_v33 = vpop.permute.xlu0 %994  ;;  %v2801_v5 = vpack.i.bf16 %v959_v17, %v961_v9 }
 0x57a   :  { %2666 = vmatpush.xpose.msk.msrb.mxu1 %vm1014_vm10, %v3655_v33 }
 0x57d   :  { %2659 = vmatpush.xpose.msk.msrb.mxu0 %vm1014_vm10, %v989_v25 }
 0x580   :  { %v3651_v29 = vpop.permute.xlu1 %1006 }
 0x581   :  { %2660 = vmatpush.xpose.msk.msrb.mxu0 %vm1014_vm10, %v3637_v13  ;;  %v2826_v30 = vpack.i.bf16 %v3637_v13, %v3651_v29 }
 0x585   :  { %2661 = vmatpush.xpose.msk.msrb.mxu0 %vm1014_vm10, %v3643_v28 }
 0x588   :  { %v3660_v3 = vpop.permute.xlu1 %992 }
 0x589   :  { %2667 = vmatpush.xpose.msk.msrb.mxu1 %vm1014_vm10, %v3660_v3 }
 0x5d4   :  { %v859_v31 = vpop.f32.mrf.mxu1 }
 0x5d5   :  { %v860_v21 = vadd.f32 %v859_v31, %v835_v36 }
 0x5d7   :  { %930 = vrot.lane.b32.xlu2 %v860_v21, %s2998_s16  ;;  %2639 = vmatmul.msk.f32.vlgmr.msra.gmra.mxu3 %vm1014_vm10, %v860_v21 }
 0x5d8   :  { %934 = vrot.lane.b32.xlu0 %v860_v21, %s3004_s30  ;;  %926 = vrot.lane.b32.xlu1 %v860_v21, %s3005_s9 }
 0x5d9   :  { %2677 = vmatpush.xpose.msk.msra.mxu3 %vm1014_vm10, %v3616_v2 }
 0x5dc   :  { %v862_v40 = vpop.f32.mrf.mxu1 }
 0x5dd   :  { %v863_v60 = vadd.f32 %v862_v40, %v835_v36  ;;  %2678 = vmatpush.xpose.msk.msra.mxu3 %vm1014_vm10, %v3635_v20 }
 0x5df   :  { %946 = vrot.lane.b32.xlu2 %v860_v21, %s2999_s0  ;;  %2640 = vmatmul.msk.f32.gmra.mxu3 %vm1014_vm10, %v863_v60 }
 0x5e0   :  { %950 = vrot.lane.b32.xlu1 %v860_v21, %s3006_s18  ;;  %936 = vrot.lane.b32.xlu0 %v863_v60, %s3004_s30 }
 0x5e1   :  { %2679 = vmatpush.xpose.msk.msra.mxu3 %vm1014_vm10, %v1009_v12 }
 0x5e5   :  { %2680 = vmatpush.xpose.msk.msra.mxu3 %vm1014_vm10, %v3651_v29 }
 0x5e7   :  { %932 = vrot.lane.b32.xlu2 %v863_v60, %s2998_s16 }
 0x5e8   :  { %928 = vrot.lane.b32.xlu1 %v863_v60, %s3005_s9  ;;  %982 = vrot.lane.b32.xlu0 %v3494_v55, %s3000_s17 }
 0x5ef   :  { %952 = vrot.lane.b32.xlu2 %v863_v60, %s3006_s18 }
 0x5f0   :  { %990 = vrot.lane.b32.xlu1 %v3494_v55, %s3007_s19  ;;  %948 = vrot.lane.b32.xlu0 %v863_v60, %s2999_s0  ;;  %v2811_v55 = vpack.i.bf16 %v3627_v18, %v3616_v2 }
 0x5f7   :  { %938 = vrot.lane.b32.xlu2 %v860_v21, %s3000_s17 }
 0x5f8   :  { %940 = vrot.lane.b32.xlu1 %v863_v60, %s3000_s17  ;;  %942 = vrot.lane.b32.xlu0 %v860_v21, %s3007_s19 }
 0x5ff   :  { %944 = vrot.lane.b32.xlu2 %v863_v60, %s3007_s19 }
 0x600   :  { %2777 = vrot.lane.b32.xlu0 %v2776_v49, %s3001_s5  ;;  %2767 = vrot.lane.b32.xlu1 %v2766_v39, %s3001_s5 }
 0x607   :  { %2772 = vrot.lane.b32.xlu2 %v2771_v63, %s3001_s5 }
 0x608   :  { %2782 = vrot.lane.b32.xlu0 %v2781_v42, %s3001_s5  ;;  %2802 = vrot.lane.b32.xlu1 %v2801_v5, %s3001_s5 }
 0x60f   :  { %2797 = vrot.lane.b32.xlu2 %v2796_v24, %s3001_s5 }
 0x610   :  { %2787 = vrot.lane.b32.xlu0 %v2786_v34, %s3001_s5  ;;  %2822 = vrot.lane.b32.xlu1 %v2821_v27, %s3001_s5 }
 0x617   :  { %2807 = vrot.lane.b32.xlu2 %v2806_v7, %s3001_s5 }
 0x618   :  { %2792 = vrot.lane.b32.xlu0 %v2791_v52, %s3001_s5 }
 0x61f   :  { %2812 = vrot.lane.b32.xlu2 %v2811_v55, %s3001_s5 }
 0x627   :  { %2817 = vrot.lane.b32.xlu2 %v2816_v53, %s3001_s5 }
 0x631   :  { %v931_v22 = vpop.permute.xlu2 %930 }
 0x632   :  { %2651 = vmatmul.msk.f32.vlgmr.msra.gmra.mxu1 %vm1014_vm10, %v931_v22 }
 0x639   :  { %v947_v54 = vpop.permute.xlu2 %946 }
 0x63a   :  { %2675 = vmatmul.msk.f32.vlgmr.msrb.gmra.mxu2 %vm1014_vm10, %v947_v54 }
 0x641   :  { %v933_v4 = vpop.permute.xlu2 %932 }
 0x642   :  { %2652 = vmatmul.msk.f32.gmra.mxu1 %vm1014_vm10, %v933_v4 }
 0x649   :  { %v953_v35 = vpop.permute.xlu2 %952 }
 0x64a   :  { %v927_v39 = vpop.permute.xlu1 %926  ;;  %v935_v44 = vpop.permute.xlu0 %934 }
 0x64b   :  { %2645 = vmatmul.msk.f32.vlgmr.msra.gmra.mxu0 %vm1014_vm10, %v927_v39  ;;  %2657 = vmatmul.msk.f32.vlgmr.msrb.gmra.mxu3 %vm1014_vm10, %v935_v44 }
 0x651   :  { %v939_v38 = vpop.permute.xlu2 %938 }
 0x652   :  { %v951_v23 = vpop.permute.xlu1 %950  ;;  %v937_v37 = vpop.permute.xlu0 %936 }
 0x653   :  { %2658 = vmatmul.msk.f32.gmra.mxu3 %vm1014_vm10, %v937_v37 }
 0x659   :  { %v945_v47 = vpop.permute.xlu2 %944 }
 0x65a   :  { %v929_v61 = vpop.permute.xlu1 %928  ;;  %v3733_v48 = vpop.permute.xlu0 %982 }
 0x65b   :  { %v1044_v32 = vpop.f32.mrf.mxu3  ;;  %2646 = vmatmul.msk.f32.gmra.mxu0 %vm1014_vm10, %v929_v61  ;;  %2681 = vmatmul.msk.f32.vlgmr.msra.gmra.mxu3 %vm1014_vm10, %v951_v23 }
 0x65c   :  { %v1295_v46 = vmul.f32 0.5, %v1044_v32  ;;  %2662 = vmatpush.xpose.msk.msrb.mxu0 %vm1014_vm10, %v3733_v48 }
 0x65e   :  { %v3745_v49 = vadd.f32 %v1295_v46, %v3740_v41 }
 0x660   :  { %v1327_v50 = vsel %vm67_vm0, %v3745_v49, -inf }
 0x661   :  { %1328 = vmax.xlane.f32.xlu2 %v1327_v50  ;;  %v2773_v51 = vpop.permute.xlu2 %2772 }
 0x662   :  { %v3749_v8 = vpop.permute.xlu1 %990  ;;  %v2774_v56 = vunpack.i.l.bf16 %v2773_v51  ;;  %v949_v15 = vpop.permute.xlu0 %948  ;;  %v2775_v18 = vunpack.i.h.bf16 %v2773_v51 }
 0x663   :  { %v1047_v16 = vpop.f32.mrf.mxu3  ;;  %2663 = vmatmul.msk.f32.vlgmr.msrb.gmra.mxu0 %vm1014_vm10, %v939_v38  ;;  %2668 = vmatpush.xpose.msk.msrb.mxu1 %vm1014_vm10, %v3749_v8 }
 0x664   :  { %v1296_v14 = vmul.f32 0.5, %v1047_v16  ;;  %2676 = vmatmul.msk.f32.gmra.mxu2 %vm1014_vm10, %v949_v15  ;;  %2682 = vmatmul.msk.f32.gmra.mxu3 %vm1014_vm10, %v953_v35 }
 0x665   :  { %1864 = vmatpush.msrb.mxu3 %v2774_v56 }
 0x666   :  { %v3762_v57 = vadd.f32 %v1296_v14, %v3757_v11 }
 0x668   :  { %v1330_v58 = vsel %vm67_vm0, %v3762_v57, -inf }
 0x669   :  { %1331 = vmax.xlane.f32.xlu0 %v1330_v58  ;;  %v2798_v59 = vpop.permute.xlu2 %2797 }
 0x66a   :  { %v941_v62 = vpop.permute.xlu1 %940  ;;  %v943_v63 = vpop.permute.xlu0 %942  ;;  %v2800_v35 = vunpack.i.h.bf16 %v2798_v59  ;;  %v2799_v39 = vunpack.i.l.bf16 %v2798_v59 }
 0x66b   :  { %2664 = vmatmul.msk.f32.gmra.mxu0 %vm1014_vm10, %v941_v62  ;;  %2669 = vmatmul.msk.f32.vlgmr.msrb.gmra.mxu1 %vm1014_vm10, %v943_v63 }
 0x671   :  { %v2808_v0 = vpop.permute.xlu2 %2807 }
 0x672   :  { %v2768_v45 = vpop.permute.xlu1 %2767  ;;  %v2778_v2 = vpop.permute.xlu0 %2777  ;;  %v2809_v12 = vunpack.i.l.bf16 %v2808_v0  ;;  %v2810_v31 = vunpack.i.h.bf16 %v2808_v0 }
 0x673   :  { %v2769_v6 = vunpack.i.l.bf16 %v2768_v45  ;;  %v2779_v7 = vunpack.i.l.bf16 %v2778_v2  ;;  %2670 = vmatmul.msk.f32.gmra.mxu1 %vm1014_vm10, %v945_v47  ;;  %v2770_v9 = vunpack.i.h.bf16 %v2768_v45  ;;  %v2780_v19 = vunpack.i.h.bf16 %v2778_v2 }
 0x675   :  { %1823 = vmatpush.msra.mxu2 %v2769_v6  ;;  %1865 = vmatpush.msrb.mxu3 %v2779_v7 }
 0x677   :  { %1824 = vmatpush.msra.mxu2 %v2770_v9 }
 0x679   :  { %1825 = vmatpush.msra.mxu2 %v2775_v18  ;;  %v2813_v20 = vpop.permute.xlu2 %2812 }
 0x67a   :  { %v2783_v17 = vpop.permute.xlu0 %2782  ;;  %v2803_v25 = vpop.permute.xlu1 %2802  ;;  %v2815_v21 = vunpack.i.h.bf16 %v2813_v20  ;;  %v2814_v34 = vunpack.i.l.bf16 %v2813_v20 }
 0x67b   :  { %v2785_v27 = vunpack.i.h.bf16 %v2783_v17  ;;  %v2784_v36 = vunpack.i.l.bf16 %v2783_v17  ;;  %1826 = vmatpush.msra.mxu2 %v2780_v19  ;;  %v2804_v38 = vunpack.i.l.bf16 %v2803_v25  ;;  %v2805_v23 = vunpack.i.h.bf16 %v2803_v25 }
 0x67d   :  { %1987 = vmatpush.msrb.mxu2 %v2809_v12  ;;  %1741 = vmatpush.msra.mxu0 %v2785_v27 }
 0x67e   :  { %1866 = vmatpush.msrb.mxu3 %v2784_v36 }
 0x67f   :  { %1988 = vmatpush.msrb.mxu2 %v2810_v31 }
 0x681   :  { %1989 = vmatpush.msrb.mxu2 %v2815_v21  ;;  %v2818_v40 = vpop.permute.xlu2 %2817 }
 0x682   :  { %v2820_v60 = vunpack.i.h.bf16 %v2818_v40  ;;  %v2788_v42 = vpop.permute.xlu0 %2787  ;;  %v2823_v52 = vpop.permute.xlu1 %2822  ;;  %v2819_v55 = vunpack.i.l.bf16 %v2818_v40 }
 0x683   :  { %v2790_v5 = vunpack.i.h.bf16 %v2788_v42  ;;  %v2789_v24 = vunpack.i.l.bf16 %v2788_v42  ;;  %v2824_v53 = vunpack.i.l.bf16 %v2823_v52  ;;  %v2825_v44 = vunpack.i.h.bf16 %v2823_v52 }
 0x684   :  { %1990 = vmatpush.msrb.mxu2 %v2820_v60 }
 0x685   :  { %1742 = vmatpush.msra.mxu0 %v2790_v5  ;;  %1867 = vmatpush.msrb.mxu3 %v2789_v24 }
 0x687   :  { %2028 = vmatpush.msra.mxu3 %v2814_v34 }
 0x689   :  { %2029 = vmatpush.msra.mxu3 %v2819_v55 }
 0x68a   :  { %v2793_v22 = vpop.permute.xlu0 %2792 }
 0x68b   :  { %2030 = vmatpush.msra.mxu3 %v2824_v53  ;;  %v2795_v54 = vunpack.i.h.bf16 %v2793_v22  ;;  %v2794_v4 = vunpack.i.l.bf16 %v2793_v22 }
 0x68d   :  { %1743 = vmatpush.msra.mxu0 %v2795_v54  ;;  %1782 = vmatpush.msra.mxu1 %v2794_v4 }
 0x68f   :  { %1744 = vmatpush.msra.mxu0 %v2800_v35  ;;  %1783 = vmatpush.msra.mxu1 %v2799_v39 }
 0x691   :  { %1905 = vmatpush.msrb.mxu0 %v2825_v44  ;;  %1784 = vmatpush.msra.mxu1 %v2804_v38 }
 0x693   :  { %1785 = vmatpush.msra.mxu1 %v2805_v23 }
 0x6af   :  { %v1114_v37 = vpop.f32.mrf.mxu1 }
 0x6b0   :  { %v1299_v47 = vmul.f32 0.5, %v1114_v37 }
 0x6b2   :  { %v3770_v61 = vadd.f32 %v1299_v47, %v3740_v41 }
 0x6b4   :  { %v1339_v32 = vsel %vm67_vm0, %v3770_v61, -inf }
 0x6b5   :  { %1340 = vmax.xlane.f32.xlu0 %v1339_v32 }
 0x6bd   :  { %v1254_v0 = vpop.f32.mrf.mxu2 }
 0x6be   :  { %v1307_v45 = vmul.f32 0.5, %v1254_v0 }
 0x6bf   :  { %v1117_v46 = vpop.f32.mrf.mxu1 }
 0x6c0   :  { %v1300_v50 = vmul.f32 0.5, %v1117_v46  ;;  %v3790_v18 = vadd.f32 %v1307_v45, %v3740_v41 }
 0x6c2   :  { %v3775_v51 = vadd.f32 %v1300_v50, %v3757_v11  ;;  %v1363_v17 = vsel %vm67_vm0, %v3790_v18, -inf }
 0x6c4   :  { %v1342_v56 = vsel %vm67_vm0, %v3775_v51, -inf }
 0x6c5   :  { %1343 = vmax.xlane.f32.xlu0 %v1342_v56 }
 0x6c8   :  { %v1079_v15 = vpop.f32.mrf.mxu0 }
 0x6c9   :  { %v1297_v16 = vmul.f32 0.5, %v1079_v15 }
 0x6cb   :  { %v3780_v14 = vadd.f32 %v1297_v16, %v3740_v41 }
 0x6cd   :  { %v1333_v58 = vsel %vm67_vm0, %v3780_v14, -inf }
 0x6ce   :  { %1334 = vmax.xlane.f32.xlu1 %v1333_v58  ;;  %v1149_v59 = vpop.f32.mrf.mxu3 }
 0x6cf   :  { %v1301_v62 = vmul.f32 0.5, %v1149_v59 }
 0x6d1   :  { %v3785_v63 = vadd.f32 %v1301_v62, %v3740_v41 }
 0x6d3   :  { %v1345_v2 = vsel %vm67_vm0, %v3785_v63, -inf }
 0x6d4   :  { %v1329_v36 = vpop.xlane.xlu2 %1328 }
 0x6d5   :  { %v1375_v60 = vsub.f32 %v3745_v49, %v1329_v36 }
 0x6d6   :  { %1346 = vmax.xlane.f32.xlu1 %v1345_v2  ;;  %v1152_v6 = vpop.f32.mrf.mxu3 }
 0x6d7   :  { %v1302_v20 = vmul.f32 0.5, %v1152_v6  ;;  %v1391_v34 = vmul.f32 1.442695, %v1375_v60 }
 0x6d8   :  { %v1082_v7 = vpop.f32.mrf.mxu0 }
 0x6d9   :  { %v1298_v9 = vmul.f32 0.5, %v1082_v7  ;;  %v3800_v21 = vadd.f32 %v1302_v20, %v3757_v11  ;;  %2891 = vpow2.f32 %v1391_v34 }
 0x6db   :  { %v3793_v19 = vadd.f32 %v1298_v9, %v3757_v11  ;;  %v1348_v42 = vsel %vm67_vm0, %v3800_v21, -inf }
 0x6dc   :  { %v1332_v38 = vpop.xlane.xlu0 %1331 }
 0x6dd   :  { %v1336_v12 = vsel %vm67_vm0, %v3793_v19, -inf  ;;  %v1376_v47 = vsub.f32 %v3762_v57, %v1332_v38 }
 0x6de   :  { %1337 = vmax.xlane.f32.xlu2 %v1336_v12  ;;  %1364 = vmax.xlane.f32.xlu1 %v1363_v17  ;;  %v1289_v25 = vpop.f32.mrf.mxu3 }
 0x6df   :  { %v3820_v35 = vpop.eup %2891  ;;  %v1309_v39 = vmul.f32 0.5, %v1289_v25  ;;  %v1393_v50 = vmul.f32 1.442695, %v1376_v47 }
 0x6e0   :  { %v1184_v27 = vpop.f32.mrf.mxu0  ;;  %v1423_v44 = vsel %vm67_vm0, %v3820_v35, 0.0 }
 0x6e1   :  { %v1303_v31 = vmul.f32 0.5, %v1184_v27  ;;  %v3825_v23 = vadd.f32 %v1309_v39, %v3740_v41  ;;  %2893 = vpow2.f32 %v1393_v50 }
 0x6e3   :  { %v3803_v40 = vadd.f32 %v1303_v31, %v3740_v41  ;;  %v1369_v46 = vsel %vm67_vm0, %v3825_v23, -inf }
 0x6e5   :  { %v1351_v5 = vsel %vm67_vm0, %v3803_v40, -inf }
 0x6e6   :  { %1349 = vmax.xlane.f32.xlu2 %v1348_v42  ;;  %1352 = vmax.xlane.f32.xlu1 %v1351_v5 }
 0x6e7   :  { %v1292_v24 = vpop.f32.mrf.mxu3  ;;  %v3839_v57 = vpop.eup %2893 }
 0x6e8   :  { %v1310_v52 = vmul.f32 0.5, %v1292_v24  ;;  %v1219_v55 = vpop.f32.mrf.mxu1  ;;  %v1426_v15 = vsel %vm67_vm0, %v3839_v57, 0.0  ;;  %v1257_v16 = vpop.f32.mrf.mxu2 }
 0x6e9   :  { %v1305_v53 = vmul.f32 0.5, %v1219_v55  ;;  %v1308_v58 = vmul.f32 0.5, %v1257_v16  ;;  %v1187_v29 = vpop.f32.mrf.mxu0 }
 0x6ea   :  { %v3811_v22 = vadd.f32 %v1310_v52, %v3757_v11 }
 0x6eb   :  { %v3814_v54 = vadd.f32 %v1305_v53, %v3740_v41  ;;  %v3844_v13 = vadd.f32 %v1308_v58, %v3757_v11 }
 0x6ec   :  { %v1372_v49 = vsel %vm67_vm0, %v3811_v22, -inf }
 0x6ed   :  { %v1357_v4 = vsel %vm67_vm0, %v3814_v54, -inf  ;;  %v1366_v59 = vsel %vm67_vm0, %v3844_v13, -inf }
 0x6ee   :  { %1373 = vmax.xlane.f32.xlu1 %v1372_v49  ;;  %1358 = vmax.xlane.f32.xlu0 %v1357_v4 }
 0x6f0   :  { %v1222_v37 = vpop.f32.mrf.mxu1 }
 0x6f1   :  { %v1306_v32 = vmul.f32 0.5, %v1222_v37 }
 0x6f3   :  { %v3835_v56 = vadd.f32 %v1306_v32, %v3757_v11 }
 0x6f5   :  { %v1360_v41 = vsel %vm67_vm0, %v3835_v56, -inf }
 0x6f6   :  { %1424 = vadd.xlane.f32.xlu0 %v1423_v44 }
 0x6fe   :  { %2827 = vrot.lane.b32.xlu2 %v2826_v30, %s3001_s5  ;;  %1370 = vmax.xlane.f32.xlu0 %v1369_v46  ;;  %v1304_v30 = vmul.f32 0.5, %v1187_v29 }
 0x700   :  { %v3850_v45 = vadd.f32 %v1304_v30, %v3757_v11 }
 0x702   :  { %v1354_v6 = vsel %vm67_vm0, %v3850_v45, -inf }
 0x706   :  { %1361 = vmax.xlane.f32.xlu0 %v1360_v41 }
 0x70e   :  { %1427 = vadd.xlane.f32.xlu0 %v1426_v15 }
 0x727   :  { %1367 = vmax.xlane.f32.xlu2 %v1366_v59 }
 0x728   :  { %v1341_v62 = vpop.xlane.xlu0 %1340 }
 0x729   :  { %v1379_v0 = vsub.f32 %v3770_v61, %v1341_v62 }
 0x72b   :  { %v1399_v2 = vmul.f32 1.442695, %v1379_v0 }
 0x72d   :  { %2895 = vpow2.f32 %v1399_v2 }
 0x72f   :  { %1355 = vmax.xlane.f32.xlu2 %v1354_v6 }
 0x733   :  { %v3854_v7 = vpop.eup %2895 }
 0x734   :  { %v1435_v9 = vsel %vm67_vm0, %v3854_v7, 0.0 }
 0x735   :  { %1436 = vadd.xlane.f32.xlu1 %v1435_v9 }
 0x738   :  { %v1344_v20 = vpop.xlane.xlu0 %1343 }
 0x739   :  { %v1380_v12 = vsub.f32 %v3775_v51, %v1344_v20 }
 0x73b   :  { %v1401_v17 = vmul.f32 1.442695, %v1380_v12 }
 0x73d   :  { %2897 = vpow2.f32 %v1401_v17 }
 0x741   :  { %v1335_v61 = vpop.xlane.xlu1 %1334 }
 0x742   :  { %v1377_v11 = vsub.f32 %v3780_v14, %v1335_v61 }
 0x743   :  { %v3860_v25 = vpop.eup %2897 }
 0x744   :  { %v1395_v27 = vmul.f32 1.442695, %v1377_v11  ;;  %v1438_v36 = vsel %vm67_vm0, %v3860_v25, 0.0 }
 0x745   :  { %1439 = vadd.xlane.f32.xlu1 %v1438_v36 }
 0x746   :  { %2899 = vpow2.f32 %v1395_v27 }
 0x749   :  { %v1347_v31 = vpop.xlane.xlu1 %1346 }
 0x74a   :  { %v1381_v60 = vsub.f32 %v3785_v63, %v1347_v31 }
 0x74c   :  { %v3865_v42 = vpop.eup %2899  ;;  %v1403_v5 = vmul.f32 1.442695, %v1381_v60 }
 0x74d   :  { %v1429_v51 = vsel %vm67_vm0, %v3865_v42, 0.0 }
 0x74e   :  { %2901 = vpow2.f32 %v1403_v5  ;;  %1430 = vadd.xlane.f32.xlu2 %v1429_v51 }
 0x751   :  { %v1338_v14 = vpop.xlane.xlu2 %1337  ;;  %v1365_v24 = vpop.xlane.xlu1 %1364 }
 0x752   :  { %v1378_v34 = vsub.f32 %v3793_v19, %v1338_v14  ;;  %v1387_v52 = vsub.f32 %v3790_v18, %v1365_v24 }
 0x754   :  { %v3871_v55 = vpop.eup %2901  ;;  %v1397_v53 = vmul.f32 1.442695, %v1378_v34  ;;  %v1415_v49 = vmul.f32 1.442695, %v1387_v52 }
 0x755   :  { %v1441_v63 = vsel %vm67_vm0, %v3871_v55, 0.0 }
 0x756   :  { %2903 = vpow2.f32 %v1397_v53  ;;  %1442 = vadd.xlane.f32.xlu2 %v1441_v63 }
 0x757   :  { %2905 = vpow2.f32 %v1415_v49 }
 0x759   :  { %v1350_v4 = vpop.xlane.xlu2 %1349  ;;  %v1353_v44 = vpop.xlane.xlu1 %1352 }
 0x75a   :  { %v1382_v39 = vsub.f32 %v3800_v21, %v1350_v4  ;;  %v1383_v18 = vsub.f32 %v3803_v40, %v1353_v44 }
 0x75c   :  { %v3876_v38 = vpop.eup %2903  ;;  %v1405_v37 = vmul.f32 1.442695, %v1382_v39  ;;  %v1407_v46 = vmul.f32 1.442695, %v1383_v18 }
 0x75d   :  { %v3878_v19 = vpop.eup %2905  ;;  %v1432_v47 = vsel %vm67_vm0, %v3876_v38, 0.0 }
 0x75e   :  { %2907 = vpow2.f32 %v1405_v37  ;;  %v1459_v32 = vsel %vm67_vm0, %v3878_v19, 0.0  ;;  %1433 = vadd.xlane.f32.xlu1 %v1432_v47  ;;  %v2841_v37 = vpack.i.bf16 %v3749_v8, %v3660_v3 }
 0x75f   :  { %1460 = vadd.xlane.f32.xlu0 %v1459_v32  ;;  %2909 = vpow2.f32 %v1407_v46 }
 0x761   :  { %v2828_v50 = vpop.permute.xlu2 %2827  ;;  %v1359_v15 = vpop.xlane.xlu0 %1358 }
 0x762   :  { %v2830_v21 = vunpack.i.h.bf16 %v2828_v50  ;;  %v2829_v41 = vunpack.i.l.bf16 %v2828_v50  ;;  %v1385_v32 = vsub.f32 %v3814_v54, %v1359_v15  ;;  %v1374_v50 = vpop.xlane.xlu1 %1373 }
 0x764   :  { %v3885_v16 = vpop.eup %2907  ;;  %1906 = vmatpush.msrb.mxu0 %v2830_v21  ;;  %2031 = vmatpush.msra.mxu3 %v2829_v41  ;;  %v1411_v21 = vmul.f32 1.442695, %v1385_v32 }
 0x765   :  { %v1444_v40 = vsel %vm67_vm0, %v3885_v16, 0.0  ;;  %v3889_v29 = vpop.eup %2909 }
 0x766   :  { %v1447_v30 = vsel %vm67_vm0, %v3889_v29, 0.0 }
 0x767   :  { %1445 = vadd.xlane.f32.xlu0 %v1444_v40 }
 0x769   :  { %v1425_v58 = vpop.xlane.xlu0 %1424 }
 0x76a   :  { %2911 = vrcp.f32 %v1425_v58  ;;  %v1482_v9 = vand.u32 2147483648, %v1425_v58  ;;  %v1480_v17 = vand.u32 2147483647, %v1425_v58  ;;  %vm1476_vm1 = vweird.f32 %v1425_v58 }
 0x76c   :  { %v1483_v11 = vor.u32 1.1754944e-38, %v1482_v9  ;;  %vm1481_vm9 = vcmp.eq.f32.partialorder %v1480_v17, 8.507059e+37 }
 0x76f   :  { %1448 = vadd.xlane.f32.xlu0 %v1447_v30 }
 0x770   :  { %v2912_v59 = vpop.eup %2911 }
 0x771   :  { %v1472_v62 = vmul.f32 %v2912_v59, %v1425_v58  ;;  %v1371_v0 = vpop.xlane.xlu0 %1370  ;;  %vm1477_vm8 = vweird.f32 %v2912_v59 }
 0x772   :  { %v1389_v2 = vsub.f32 %v3825_v23, %v1371_v0  ;;  %vm1478_vm2 = vmor %vm1476_vm1, %vm1477_vm8 }
 0x773   :  { %v1473_v6 = vsub.f32 1.0, %v1472_v62 }
 0x774   :  { %v1419_v20 = vmul.f32 1.442695, %v1389_v2 }
 0x775   :  { %v1474_v12 = vmul.f32 %v2912_v59, %v1473_v6 }
 0x776   :  { %2913 = vpow2.f32 %v1419_v20 }
 0x777   :  { %v1475_v61 = vadd.f32 %v2912_v59, %v1474_v12 }
 0x779   :  { %v1479_v27 = vsel %vm1478_vm2, %v2912_v59, %v1475_v61  ;;  %v1362_v36 = vpop.xlane.xlu0 %1361 }
 0x77a   :  { %v1484_v31 = vsel %vm1481_vm9, %v1483_v11, %v1479_v27  ;;  %v1386_v3 = vsub.f32 %v3835_v56, %v1362_v36 }
 0x77b   :  { %v1485_v60 = vmul.f32 %v3820_v35, %v1484_v31 }
 0x77c   :  { %v3895_v5 = vpop.eup %2913  ;;  %v1413_v30 = vmul.f32 1.442695, %v1386_v3 }
 0x77d   :  { %2683 = vmatmul.msk.f32.vlgmr.msra.gmra.mxu0 %vm67_vm0, %v1485_v60  ;;  %v1465_v23 = vsel %vm67_vm0, %v3895_v5, 0.0 }
 0x77e   :  { %1466 = vadd.xlane.f32.xlu2 %v1465_v23 }
 0x781   :  { %v1428_v51 = vpop.xlane.xlu0 %1427 }
 0x782   :  { %2915 = vrcp.f32 %v1428_v51  ;;  %v1497_v52 = vand.u32 2147483648, %v1428_v51  ;;  %v1495_v49 = vand.u32 2147483647, %v1428_v51  ;;  %vm1491_vm12 = vweird.f32 %v1428_v51 }
 0x784   :  { %v1498_v35 = vor.u32 1.1754944e-38, %v1497_v52  ;;  %vm1496_vm14 = vcmp.eq.f32.partialorder %v1495_v49, 8.507059e+37 }
 0x788   :  { %v2916_v14 = vpop.eup %2915 }
 0x789   :  { %v1487_v24 = vmul.f32 %v2916_v14, %v1428_v51  ;;  %vm1492_vm11 = vweird.f32 %v2916_v14 }
 0x78a   :  { %vm1493_vm13 = vmor %vm1491_vm12, %vm1492_vm11 }
 0x78b   :  { %v1488_v34 = vsub.f32 1.0, %v1487_v24 }
 0x78d   :  { %v1489_v53 = vmul.f32 %v2916_v14, %v1488_v34 }
 0x78f   :  { %v1490_v63 = vadd.f32 %v2916_v14, %v1489_v53 }
 0x791   :  { %v1494_v4 = vsel %vm1493_vm13, %v2916_v14, %v1490_v63 }
 0x792   :  { %v1499_v39 = vsel %vm1496_vm14, %v1498_v35, %v1494_v4 }
 0x793   :  { %v1500_v44 = vmul.f32 %v3839_v57, %v1499_v39  ;;  %v1390_v57 = vsub.f32 %v3811_v22, %v1374_v50 }
 0x795   :  { %2684 = vmatmul.msk.f32.gmra.mxu0 %vm67_vm0, %v1500_v44  ;;  %v1421_v54 = vmul.f32 1.442695, %v1390_v57 }
 0x796   :  { %2842 = vrot.lane.b32.xlu2 %v2841_v37, %s3001_s5 }
 0x79a   :  { %v1368_v18 = vpop.xlane.xlu2 %1367 }
 0x79b   :  { %v1388_v47 = vsub.f32 %v3844_v13, %v1368_v18 }
 0x79d   :  { %v1417_v46 = vmul.f32 1.442695, %v1388_v47 }
 0x79f   :  { %2917 = vpow2.f32 %v1417_v46 }
 0x7a0   :  { %2919 = vpow2.f32 %v1411_v21 }
 0x7a2   :  { %v1356_v41 = vpop.xlane.xlu2 %1355 }
 0x7a3   :  { %v1384_v40 = vsub.f32 %v3850_v45, %v1356_v41 }
 0x7a5   :  { %v3909_v58 = vpop.eup %2917  ;;  %v1409_v8 = vmul.f32 1.442695, %v1384_v40  ;;  %v2836_v40 = vpack.i.bf16 %v3733_v48, %v3655_v33 }
 0x7a6   :  { %v1462_v13 = vsel %vm67_vm0, %v3909_v58, 0.0  ;;  %v3914_v59 = vpop.eup %2919 }
 0x7a7   :  { %2921 = vpow2.f32 %v1409_v8  ;;  %1463 = vadd.xlane.f32.xlu1 %v1462_v13  ;;  %v1453_v56 = vsel %vm67_vm0, %v3914_v59, 0.0 }
 0x7a8   :  { %v1437_v15 = vpop.xlane.xlu1 %1436 }
 0x7a9   :  { %2923 = vrcp.f32 %v1437_v15  ;;  %v1542_v20 = vand.u32 2147483648, %v1437_v15  ;;  %v1540_v17 = vand.u32 2147483647, %v1437_v15  ;;  %vm1536_vm3 = vweird.f32 %v1437_v15 }
 0x7aa   :  { %2925 = vpow2.f32 %v1421_v54 }
 0x7ab   :  { %2927 = vpow2.f32 %v1413_v30  ;;  %v1543_v36 = vor.u32 1.1754944e-38, %v1542_v20  ;;  %vm1541_vm4 = vcmp.eq.f32.partialorder %v1540_v17, 8.507059e+37 }
 0x7ad   :  { %v3916_v45 = vpop.eup %2921 }
 0x7ae   :  { %v1450_v22 = vsel %vm67_vm0, %v3916_v45, 0.0 }
 0x7af   :  { %v2924_v62 = vpop.eup %2923  ;;  %1451 = vadd.xlane.f32.xlu0 %v1450_v22  ;;  %1454 = vadd.xlane.f32.xlu1 %v1453_v56 }
 0x7b0   :  { %v1532_v0 = vmul.f32 %v2924_v62, %v1437_v15  ;;  %v3922_v2 = vpop.eup %2925  ;;  %vm1537_vm15 = vweird.f32 %v2924_v62 }
 0x7b1   :  { %v3924_v9 = vpop.eup %2927  ;;  %v1468_v11 = vsel %vm67_vm0, %v3922_v2, 0.0  ;;  %vm1538_vm5 = vmor %vm1536_vm3, %vm1537_vm15 }
 0x7b2   :  { %v1533_v6 = vsub.f32 1.0, %v1532_v0  ;;  %v1456_v27 = vsel %vm67_vm0, %v3924_v9, 0.0 }
 0x7b4   :  { %v1534_v12 = vmul.f32 %v2924_v62, %v1533_v6 }
 0x7b6   :  { %v1535_v61 = vadd.f32 %v2924_v62, %v1534_v12 }
 0x7b7   :  { %1469 = vadd.xlane.f32.xlu1 %v1468_v11  ;;  %1457 = vadd.xlane.f32.xlu0 %v1456_v27 }
 0x7b8   :  { %v1539_v31 = vsel %vm1538_vm5, %v2924_v62, %v1535_v61  ;;  %v1440_v60 = vpop.xlane.xlu1 %1439 }
 0x7b9   :  { %v1544_v23 = vsel %vm1541_vm4, %v1543_v36, %v1539_v31  ;;  %2929 = vrcp.f32 %v1440_v60  ;;  %v1557_v53 = vand.u32 2147483648, %v1440_v60  ;;  %v1555_v63 = vand.u32 2147483647, %v1440_v60 }
 0x7ba   :  { %v1545_v51 = vmul.f32 %v3854_v7, %v1544_v23  ;;  %vm1551_vm7 = vweird.f32 %v1440_v60  ;;  %v2831_v7 = vpack.i.bf16 %v3643_v28, %v3645_v26 }
 0x7bb   :  { %v1558_v4 = vor.u32 1.1754944e-38, %v1557_v53  ;;  %vm1556_vm1 = vcmp.eq.f32.partialorder %v1555_v63, 8.507059e+37 }
 0x7bc   :  { %2687 = vmatmul.msk.f32.vlgmr.msra.gmra.mxu2 %vm67_vm0, %v1545_v51 }
 0x7bf   :  { %v2930_v14 = vpop.eup %2929 }
 0x7c0   :  { %v1547_v24 = vmul.f32 %v2930_v14, %v1440_v60  ;;  %vm1552_vm6 = vweird.f32 %v2930_v14 }
 0x7c1   :  { %v1431_v34 = vpop.xlane.xlu2 %1430  ;;  %vm1553_vm8 = vmor %vm1551_vm7, %vm1552_vm6 }
 0x7c2   :  { %v1548_v52 = vsub.f32 1.0, %v1547_v24  ;;  %2931 = vrcp.f32 %v1431_v34  ;;  %v1512_v50 = vand.u32 2147483648, %v1431_v34  ;;  %v1510_v41 = vand.u32 2147483647, %v1431_v34 }
 0x7c3   :  { %vm1506_vm9 = vweird.f32 %v1431_v34 }
 0x7c4   :  { %v1549_v49 = vmul.f32 %v2930_v14, %v1548_v52  ;;  %v1513_v26 = vor.u32 1.1754944e-38, %v1512_v50  ;;  %vm1511_vm12 = vcmp.eq.f32.partialorder %v1510_v41, 8.507059e+37 }
 0x7c6   :  { %v1550_v35 = vadd.f32 %v2930_v14, %v1549_v49 }
 0x7c8   :  { %v2932_v39 = vpop.eup %2931  ;;  %v1554_v44 = vsel %vm1553_vm8, %v2930_v14, %v1550_v35 }
 0x7c9   :  { %v1502_v37 = vmul.f32 %v2932_v39, %v1431_v34  ;;  %v1443_v18 = vpop.xlane.xlu2 %1442  ;;  %v1559_v47 = vsel %vm1556_vm1, %v1558_v4, %v1554_v44  ;;  %vm1507_vm2 = vweird.f32 %v2932_v39 }
 0x7ca   :  { %2933 = vrcp.f32 %v1443_v18  ;;  %v1560_v46 = vmul.f32 %v3860_v25, %v1559_v47  ;;  %vm1508_vm11 = vmor %vm1506_vm9, %vm1507_vm2  ;;  %v1572_v30 = vand.u32 2147483648, %v1443_v18  ;;  %v1570_v48 = vand.u32 2147483647, %v1443_v18 }
 0x7cb   :  { %v1503_v32 = vsub.f32 1.0, %v1502_v37  ;;  %2832 = vrot.lane.b32.xlu0 %v2831_v7, %s3001_s5  ;;  %vm1566_vm14 = vweird.f32 %v1443_v18 }
 0x7cc   :  { %2688 = vmatmul.msk.f32.gmra.mxu2 %vm67_vm0, %v1560_v46  ;;  %v1573_v0 = vor.u32 1.1754944e-38, %v1572_v30  ;;  %vm1571_vm3 = vcmp.eq.f32.partialorder %v1570_v48, 8.507059e+37  ;;  %v918_v48 = vld [vmem:[%s4207_s10 + $0x8] sm:$0xf] }
 0x7cd   :  { %v1504_v21 = vmul.f32 %v2932_v39, %v1503_v32 }
 0x7cf   :  { %v1505_v57 = vadd.f32 %v2932_v39, %v1504_v21 }
 0x7d0   :  { %v2934_v28 = vpop.eup %2933  ;;  %2837 = vrot.lane.b32.xlu1 %v2836_v40, %s3001_s5 }
 0x7d1   :  { %v1509_v3 = vsel %vm1508_vm11, %v2932_v39, %v1505_v57  ;;  %v1562_v8 = vmul.f32 %v2934_v28, %v1443_v18  ;;  %v1434_v25 = vpop.xlane.xlu1 %1433  ;;  %vm1567_vm13 = vweird.f32 %v2934_v28 }
 0x7d2   :  { %v1514_v13 = vsel %vm1511_vm12, %v1513_v26, %v1509_v3  ;;  %2935 = vrcp.f32 %v1434_v25  ;;  %v1461_v54 = vpop.xlane.xlu0 %1460  ;;  %vm1568_vm15 = vmor %vm1566_vm14, %vm1567_vm13  ;;  %v1525_v51 = vand.u32 2147483647, %v1434_v25  ;;  %vm1521_vm6 = vweird.f32 %v1434_v25 }
 0x7d3   :  { %v1563_v15 = vsub.f32 1.0, %v1562_v8  ;;  %2937 = vrcp.f32 %v1461_v54  ;;  %v1515_v22 = vmul.f32 %v3865_v42, %v1514_v13  ;;  %v1527_v42 = vand.u32 2147483648, %v1434_v25 }
 0x7d4   :  { %v1662_v23 = vand.u32 2147483648, %v1461_v54  ;;  %v1660_v24 = vand.u32 2147483647, %v1461_v54  ;;  %vm1656_vm7 = vweird.f32 %v1461_v54  ;;  %vm1526_vm2 = vcmp.eq.f32.partialorder %v1525_v51, 8.507059e+37 }
 0x7d5   :  { %v1564_v33 = vmul.f32 %v2934_v28, %v1563_v15  ;;  %2685 = vmatmul.msk.f32.vlgmr.msra.gmra.mxu1 %vm67_vm0, %v1515_v22  ;;  %v1528_v52 = vor.u32 1.1754944e-38, %v1527_v42 }
 0x7d6   :  { %v1663_v63 = vor.u32 1.1754944e-38, %v1662_v23  ;;  %vm1661_vm9 = vcmp.eq.f32.partialorder %v1660_v24, 8.507059e+37 }
 0x7d7   :  { %v1565_v56 = vadd.f32 %v2934_v28, %v1564_v33 }
 0x7d8   :  { %v2936_v62 = vpop.eup %2935 }
 0x7d9   :  { %v2938_v6 = vpop.eup %2937  ;;  %v1569_v20 = vsel %vm1568_vm15, %v2934_v28, %v1565_v56  ;;  %v1517_v12 = vmul.f32 %v2936_v62, %v1434_v25  ;;  %vm1522_vm5 = vweird.f32 %v2936_v62 }
 0x7da   :  { %v1574_v17 = vsel %vm1571_vm3, %v1573_v0, %v1569_v20  ;;  %v1652_v61 = vmul.f32 %v2938_v6, %v1461_v54  ;;  %v1446_v11 = vpop.xlane.xlu0 %1445  ;;  %vm1657_vm4 = vweird.f32 %v2938_v6  ;;  %vm1523_vm8 = vmor %vm1521_vm6, %vm1522_vm5  ;;  %vm2045_vm6 = vcmask 1043456  }
 0x7db   :  { %v1518_v27 = vsub.f32 1.0, %v1517_v12  ;;  %2939 = vrcp.f32 %v1446_v11  ;;  %v1575_v31 = vmul.f32 %v3871_v55, %v1574_v17  ;;  %vm1658_vm1 = vmor %vm1656_vm7, %vm1657_vm4  ;;  %v1587_v47 = vand.u32 2147483648, %v1446_v11  ;;  %2705 = vmatpush.msk.msra.mxu2 %vm2045_vm6, %v918_v48  ;;  %v919_v48 = vld [vmem:[%s4207_s10 + $0xc] sm:$0xf] }
 0x7dc   :  { %v1653_v36 = vsub.f32 1.0, %v1652_v61  ;;  %v1585_v46 = vand.u32 2147483647, %v1446_v11  ;;  %vm1581_vm12 = vweird.f32 %v1446_v11 }
 0x7dd   :  { %v1519_v60 = vmul.f32 %v2936_v62, %v1518_v27  ;;  %2689 = vmatmul.msk.f32.vlgmr.msrb.gmra.mxu3 %vm67_vm0, %v1575_v31  ;;  %v1588_v21 = vor.u32 1.1754944e-38, %v1587_v47 }
 0x7de   :  { %v1654_v14 = vmul.f32 %v2938_v6, %v1653_v36  ;;  %vm1586_vm14 = vcmp.eq.f32.partialorder %v1585_v46, 8.507059e+37  ;;  %2708 = vmatpush.msk.msrb.mxu3 %vm2045_vm6, %v919_v48 }
 0x7df   :  { %v1520_v34 = vadd.f32 %v2936_v62, %v1519_v60 }
 0x7e0   :  { %v1655_v53 = vadd.f32 %v2938_v6, %v1654_v14 }
 0x7e1   :  { %v2940_v49 = vpop.eup %2939  ;;  %v1524_v35 = vsel %vm1523_vm8, %v2936_v62, %v1520_v34 }
 0x7e2   :  { %v1659_v55 = vsel %vm1658_vm1, %v2938_v6, %v1655_v53  ;;  %v1577_v4 = vmul.f32 %v2940_v49, %v1446_v11  ;;  %v1529_v39 = vsel %vm1526_vm2, %v1528_v52, %v1524_v35  ;;  %vm1582_vm11 = vweird.f32 %v2940_v49  ;;  %v3952_v33 = vpop.xlane.xlu0 %1448 }
 0x7e3   :  { %v1664_v44 = vsel %vm1661_vm9, %v1663_v63, %v1659_v55  ;;  %v1530_v37 = vmul.f32 %v3876_v38, %v1529_v39  ;;  %vm1583_vm13 = vmor %vm1581_vm12, %vm1582_vm11 }
 0x7e4   :  { %v1578_v7 = vsub.f32 1.0, %v1577_v4  ;;  %v1665_v18 = vmul.f32 %v3878_v19, %v1664_v44 }
 0x7e5   :  { %2686 = vmatmul.msk.f32.gmra.mxu1 %vm67_vm0, %v1530_v37 }
 0x7e6   :  { %v1579_v32 = vmul.f32 %v2940_v49, %v1578_v7  ;;  %2695 = vmatmul.msk.f32.vlgmr.msrb.gmra.mxu2 %vm67_vm0, %v1665_v18 }
 0x7e8   :  { %v1580_v50 = vadd.f32 %v2940_v49, %v1579_v32 }
 0x7ea   :  { %v1584_v41 = vsel %vm1583_vm13, %v2940_v49, %v1580_v50 }
 0x7eb   :  { %v1589_v40 = vsel %vm1586_vm14, %v1588_v21, %v1584_v41  ;;  %v1602_v41 = vand.u32 2147483648, %v3952_v33 }
 0x7ec   :  { %v1590_v57 = vmul.f32 %v3885_v16, %v1589_v40 }
 0x7ee   :  { %2690 = vmatmul.msk.f32.gmra.mxu3 %vm67_vm0, %v1590_v57 }
 0x7f1   :  { %v1467_v38 = vpop.xlane.xlu2 %1466 }
 0x7f2   :  { %2941 = vrcp.f32 %v1467_v38  ;;  %v1692_v3 = vand.u32 2147483648, %v1467_v38  ;;  %v1690_v25 = vand.u32 2147483647, %v1467_v38  ;;  %vm1686_vm3 = vweird.f32 %v1467_v38 }
 0x7f4   :  { %v1693_v54 = vor.u32 1.1754944e-38, %v1692_v3  ;;  %vm1691_vm4 = vcmp.eq.f32.partialorder %v1690_v25, 8.507059e+37 }
 0x7f8   :  { %v2942_v19 = vpop.eup %2941 }
 0x7f9   :  { %v1682_v28 = vmul.f32 %v2942_v19, %v1467_v38  ;;  %vm1687_vm15 = vweird.f32 %v2942_v19  ;;  %v1600_v38 = vand.u32 2147483647, %v3952_v33 }
 0x7fa   :  { %vm1688_vm5 = vmor %vm1686_vm3, %vm1687_vm15  ;;  %vm1596_vm15 = vweird.f32 %v3952_v33 }
 0x7fb   :  { %v1683_v26 = vsub.f32 1.0, %v1682_v28 }
 0x7fd   :  { %v1684_v8 = vmul.f32 %v2942_v19, %v1683_v26 }
 0x7ff   :  { %v1685_v13 = vadd.f32 %v2942_v19, %v1684_v8 }
 0x801   :  { %v1689_v15 = vsel %vm1688_vm5, %v2942_v19, %v1685_v13 }
 0x802   :  { %v1694_v30 = vsel %vm1691_vm4, %v1693_v54, %v1689_v15  ;;  %v1603_v15 = vor.u32 1.1754944e-38, %v1602_v41  ;;  %vm1601_vm4 = vcmp.eq.f32.partialorder %v1600_v38, 8.507059e+37 }
 0x803   :  { %v1695_v16 = vmul.f32 %v3895_v5, %v1694_v30 }
 0x805   :  { %2697 = vmatmul.msk.f32.vlgmr.msra.gmra.mxu3 %vm67_vm0, %v1695_v16 }
 0x81a   :  { %v1464_v22 = vpop.xlane.xlu1 %1463 }
 0x81b   :  { %2943 = vrcp.f32 %v1464_v22  ;;  %v1677_v12 = vand.u32 2147483648, %v1464_v22  ;;  %vm1671_vm8 = vweird.f32 %v1464_v22  ;;  %v1675_v61 = vand.u32 2147483647, %v1464_v22 }
 0x81c   :  { %2945 = vrcp.f32 %v3952_v33 }
 0x81d   :  { %v1678_v36 = vor.u32 1.1754944e-38, %v1677_v12  ;;  %vm1676_vm2 = vcmp.eq.f32.partialorder %v1675_v61, 8.507059e+37 }
 0x821   :  { %v2944_v56 = vpop.eup %2943 }
 0x822   :  { %v1667_v62 = vmul.f32 %v2944_v56, %v1464_v22  ;;  %v3958_v0 = vpop.xlane.xlu1 %1454  ;;  %v3961_v6 = vpop.xlane.xlu0 %1451  ;;  %vm1672_vm7 = vweird.f32 %v2944_v56 }
 0x823   :  { %2947 = vrcp.f32 %v3958_v0  ;;  %vm1673_vm1 = vmor %vm1671_vm8, %vm1672_vm7  ;;  %v3964_v11 = vpop.eup %2945  ;;  %v1632_v30 = vand.u32 2147483648, %v3958_v0  ;;  %vm1626_vm7 = vweird.f32 %v3958_v0  ;;  %v1630_v16 = vand.u32 2147483647, %v3958_v0 }
 0x824   :  { %v1668_v5 = vsub.f32 1.0, %v1667_v62  ;;  %v1592_v31 = vmul.f32 %v3964_v11, %v3952_v33  ;;  %vm1597_vm12 = vweird.f32 %v3964_v11 }
 0x825   :  { %vm3992_vm3 = vmor %vm1596_vm15, %vm1597_vm12  ;;  %v1633_v12 = vor.u32 1.1754944e-38, %v1632_v30 }
 0x826   :  { %v1669_v20 = vmul.f32 %v2944_v56, %v1668_v5  ;;  %v1593_v34 = vsub.f32 1.0, %v1592_v31 }
 0x828   :  { %v1670_v17 = vadd.f32 %v2944_v56, %v1669_v20  ;;  %v1594_v35 = vmul.f32 %v3964_v11, %v1593_v34 }
 0x829   :  { %v3972_v14 = vpop.eup %2947 }
 0x82a   :  { %v1470_v27 = vpop.xlane.xlu1 %1469  ;;  %v1674_v42 = vsel %vm1673_vm1, %v2944_v56, %v1670_v17  ;;  %v3969_v23 = vpop.xlane.xlu0 %1457  ;;  %v1622_v53 = vmul.f32 %v3972_v14, %v3958_v0  ;;  %v1595_v18 = vadd.f32 %v3964_v11, %v1594_v35  ;;  %vm1627_vm5 = vweird.f32 %v3972_v14  ;;  %v922_v35 = vld [vmem:[%s4207_s10 + $0x18] sm:$0xf] }
 0x82b   :  { %2949 = vrcp.f32 %v1470_v27  ;;  %v1679_v60 = vsel %vm1676_vm2, %v1678_v36, %v1674_v42  ;;  %v1707_v55 = vand.u32 2147483648, %v1470_v27  ;;  %v1705_v44 = vand.u32 2147483647, %v1470_v27  ;;  %vm4010_vm8 = vmor %vm1626_vm7, %vm1627_vm5  ;;  %v2843_v56 = vpop.permute.xlu2 %2842  ;;  %v916_v36 = vld [vmem:[%s4207_s10] sm:$0xf]  ;;  %2717 = vmatpush.msk.msrb.mxu2 %vm2045_vm6, %v922_v35 }
 0x82c   :  { %2951 = vrcp.f32 %v3961_v6  ;;  %v1680_v51 = vmul.f32 %v3909_v58, %v1679_v60  ;;  %v1623_v4 = vsub.f32 1.0, %v1622_v53  ;;  %vm1701_vm11 = vweird.f32 %v1470_v27 }
 0x82d   :  { %2953 = vrcp.f32 %v3969_v23  ;;  %v1708_v32 = vor.u32 1.1754944e-38, %v1707_v55  ;;  %vm1706_vm14 = vcmp.eq.f32.partialorder %v1705_v44, 8.507059e+37  ;;  %v1599_v28 = vsel %vm3992_vm3, %v3964_v11, %v1595_v18  ;;  %v1746_v44 = vpop.f32.mrf.mxu0 }
 0x82e   :  { %2696 = vmatmul.msk.f32.gmra.mxu2 %vm67_vm0, %v1680_v51  ;;  %v1624_v46 = vmul.f32 %v3972_v14, %v1623_v4  ;;  %v1604_v22 = vsel %vm1601_vm4, %v1603_v15, %v1599_v28  ;;  %v1617_v17 = vand.u32 2147483648, %v3961_v6  ;;  %vm1631_vm2 = vcmp.eq.f32.partialorder %v1630_v16, 8.507059e+37 }
 0x82f   :  { %v1615_v42 = vand.u32 2147483647, %v3961_v6  ;;  %v2844_v31 = vunpack.i.l.bf16 %v2843_v56  ;;  %v1647_v34 = vand.u32 2147483648, %v3969_v23 }
 0x830   :  { %v1625_v8 = vadd.f32 %v3972_v14, %v1624_v46 }
 0x831   :  { %v2950_v24 = vpop.eup %2949 }
 0x832   :  { %v3976_v52 = vpop.eup %2951  ;;  %v1697_v49 = vmul.f32 %v2950_v24, %v1470_v27  ;;  %vm1702_vm9 = vweird.f32 %v2950_v24  ;;  %v1629_v62 = vsel %vm4010_vm8, %v3972_v14, %v1625_v8  ;;  %v1605_v27 = vmul.f32 %v3889_v29, %v1604_v22 }
 0x833   :  { %v1607_v58 = vmul.f32 %v3976_v52, %v3961_v6  ;;  %v3983_v7 = vpop.eup %2953  ;;  %vm1703_vm13 = vmor %vm1701_vm11, %vm1702_vm9  ;;  %vm1612_vm1 = vweird.f32 %v3976_v52  ;;  %vm1611_vm9 = vweird.f32 %v3961_v6  ;;  %v1634_v60 = vsel %vm1631_vm2, %v1633_v12, %v1629_v62 }
 0x834   :  { %v1698_v63 = vsub.f32 1.0, %v1697_v49  ;;  %v1637_v50 = vmul.f32 %v3983_v7, %v3969_v23  ;;  %vm4034_vm11 = vmor %vm1611_vm9, %vm1612_vm1  ;;  %vm1642_vm12 = vweird.f32 %v3983_v7  ;;  %v2845_v14 = vunpack.i.h.bf16 %v2843_v56 }
 0x835   :  { %v1608_v47 = vsub.f32 1.0, %v1607_v58  ;;  %v1635_v53 = vmul.f32 %v3914_v59, %v1634_v60  ;;  %v1645_v49 = vand.u32 2147483647, %v3969_v23  ;;  %v1648_v59 = vor.u32 1.1754944e-38, %v1647_v34 }
 0x836   :  { %v1699_v39 = vmul.f32 %v2950_v24, %v1698_v63  ;;  %v1638_v25 = vsub.f32 1.0, %v1637_v50  ;;  %v920_v50 = vld [vmem:[%s4207_s10 + $0x10] sm:$0xf] }
 0x837   :  { %v1609_v26 = vmul.f32 %v3976_v52, %v1608_v47  ;;  %vm1646_vm3 = vcmp.eq.f32.partialorder %v1645_v49, 8.507059e+37  ;;  %v923_v47 = vld [vmem:[%s4207_s10 + $0x1c] sm:$0xf] }
 0x838   :  { %v1700_v37 = vadd.f32 %v2950_v24, %v1699_v39  ;;  %v1639_v0 = vmul.f32 %v3983_v7, %v1638_v25  ;;  %2720 = vmatpush.msk.msra.mxu3 %vm2045_vm6, %v923_v47 }
 0x839   :  { %v1610_v20 = vadd.f32 %v3976_v52, %v1609_v26 }
 0x83a   :  { %v1704_v21 = vsel %vm1703_vm13, %v2950_v24, %v1700_v37  ;;  %v1640_v6 = vadd.f32 %v3983_v7, %v1639_v0  ;;  %v1618_v24 = vor.u32 1.1754944e-38, %v1617_v17  ;;  %vm1641_vm13 = vweird.f32 %v3969_v23  ;;  %v1749_v37 = vpop.f32.mrf.mxu0 }
 0x83b   :  { %v1709_v40 = vsel %vm1706_vm14, %v1708_v32, %v1704_v21  ;;  %v1614_v29 = vsel %vm4034_vm11, %v3976_v52, %v1610_v20  ;;  %vm1616_vm14 = vcmp.eq.f32.partialorder %v1615_v42, 8.507059e+37  ;;  %v917_v52 = vld [vmem:[%s4207_s10 + $0x4] sm:$0xf]  ;;  %vm1643_vm15 = vmor %vm1641_vm13, %vm1642_vm12  ;;  %v921_v21 = vld [vmem:[%s4207_s10 + $0x14] sm:$0xf] }
 0x83c   :  { %v1710_v19 = vmul.f32 %v3922_v2, %v1709_v40  ;;  %v1619_v63 = vsel %vm1616_vm14, %v1618_v24, %v1614_v29  ;;  %v1644_v58 = vsel %vm1643_vm15, %v3983_v7, %v1640_v6  ;;  %vm2461_vm14 = vcmask 523264  }
 0x83d   :  { %v2833_v3 = vpop.permute.xlu0 %2832  ;;  %v1620_v23 = vmul.f32 %v3916_v45, %v1619_v63  ;;  %v1649_v55 = vsel %vm1646_vm3, %v1648_v59, %v1644_v58 }
 0x83e   :  { %v2835_v13 = vunpack.i.h.bf16 %v2833_v3  ;;  %v2834_v54 = vunpack.i.l.bf16 %v2833_v3  ;;  %2698 = vmatmul.msk.f32.gmra.mxu3 %vm67_vm0, %v1710_v19  ;;  %v1650_v39 = vmul.f32 %v3924_v9, %v1649_v55 }
 0x83f   :  { %v1828_v2 = vpop.f32.mrf.mxu2 }
 0x840   :  { %1907 = vmatpush.msrb.mxu0 %v2835_v13  ;;  %1946 = vmatpush.msrb.mxu1 %v2834_v54 }
 0x841   :  { %2706 = vmatmul.msk.f32.vlgmr.msra.gmra.mxu2 %vm1014_vm10, %v1828_v2 }
 0x842   :  { %v2838_v5 = vpop.permute.xlu1 %2837 }
 0x843   :  { %v2840_v61 = vunpack.i.h.bf16 %v2838_v5  ;;  %v2839_v11 = vunpack.i.l.bf16 %v2838_v5 }
 0x845   :  { %1908 = vmatpush.msrb.mxu0 %v2840_v61  ;;  %1947 = vmatpush.msrb.mxu1 %v2839_v11 }
 0x846   :  { %2691 = vmatmul.msk.f32.vlgmr.msrb.gmra.mxu0 %vm67_vm0, %v1605_v27 }
 0x847   :  { %1948 = vmatpush.msrb.mxu1 %v2844_v31  ;;  %2699 = vmatpush.msk.msra.mxu0 %vm2045_vm6, %v916_v36  ;;  %v4101_v36 = vld [vmem:[%s4211_s14 + $0x8] sm:$0x3] }
 0x849   :  { %1949 = vmatpush.msrb.mxu1 %v2845_v14  ;;  %2711 = vmatpush.msk.msrb.mxu0 %vm2045_vm6, %v920_v50 }
 0x84a   :  { %2693 = vmatmul.msk.f32.vlgmr.msrb.gmra.mxu1 %vm67_vm0, %v1635_v53  ;;  %v2326_v53 = vperm.slane %v4101_v36, 0 }
 0x84b   :  { %2702 = vmatpush.msk.msra.mxu1 %vm2045_vm6, %v917_v52 }
 0x84d   :  { %2714 = vmatpush.msk.msrb.mxu1 %vm2045_vm6, %v921_v21 }
 0x84e   :  { %2692 = vmatmul.msk.f32.gmra.mxu0 %vm67_vm0, %v1620_v23 }
 0x84f   :  { %v1831_v4 = vpop.f32.mrf.mxu2 }
 0x850   :  { %2707 = vmatmul.msk.f32.gmra.mxu2 %vm1014_vm10, %v1831_v4 }
 0x852   :  { %2694 = vmatmul.msk.f32.gmra.mxu1 %vm67_vm0, %v1650_v39  ;;  %v1787_v7 = vpop.f32.mrf.mxu1 }
 0x856   :  { %2700 = vmatmul.msk.f32.vlgmr.msra.gmra.mxu0 %vm1014_vm10, %v1746_v44 }
 0x85a   :  { %2703 = vmatmul.msk.f32.vlgmr.msra.gmra.mxu1 %vm1014_vm10, %v1787_v7 }
 0x85e   :  { %2701 = vmatmul.msk.f32.gmra.mxu0 %vm1014_vm10, %v1749_v37 }
 0x860   :  { %v1869_v45 = vpop.f32.mrf.mxu3 }
 0x861   :  { %2709 = vmatmul.msk.f32.vlgmr.msrb.gmra.mxu3 %vm1014_vm10, %v1869_v45 }
 0x862   :  { %v1790_v18 = vpop.f32.mrf.mxu1 }
 0x863   :  { %2704 = vmatmul.msk.f32.gmra.mxu1 %vm1014_vm10, %v1790_v18 }
 0x869   :  { %v1992_v9 = vpop.f32.mrf.mxu2 }
 0x86a   :  { %2718 = vmatmul.msk.f32.vlgmr.msrb.gmra.mxu2 %vm1014_vm10, %v1992_v9 }
 0x871   :  { %v1872_v32 = vpop.f32.mrf.mxu3 }
 0x872   :  { %2710 = vmatmul.msk.f32.gmra.mxu3 %vm1014_vm10, %v1872_v32 }
 0x888   :  { %v2033_v46 = vpop.f32.mrf.mxu3 }
 0x889   :  { %2721 = vmatmul.msk.f32.vlgmr.msra.gmra.mxu3 %vm1014_vm10, %v2033_v46 }
 0x8b1   :  { %v1995_v41 = vpop.f32.mrf.mxu2 }
 0x8b2   :  { %2719 = vmatmul.msk.f32.gmra.mxu2 %vm1014_vm10, %v1995_v41 }
 0x8c1   :  { %v2036_v40 = vpop.f32.mrf.mxu3 }
 0x8c2   :  { %2722 = vmatmul.msk.f32.gmra.mxu3 %vm1014_vm10, %v2036_v40 }
 0x8c3   :  { %v1910_v57 = vpop.f32.mrf.mxu0 }
 0x8c4   :  { %2712 = vmatmul.msk.f32.vlgmr.msrb.gmra.mxu0 %vm1014_vm10, %v1910_v57  ;;  %v2130_v8 = vpop.f32.mrf.mxu2 }
 0x8c5   :  { %v2299_v33 = vsel %vm67_vm0, %v2130_v8, 0.0  ;;  %v2415_v8 = vld [vmem:[%s4208_s11 + $0x10] sm:$0xff] }
 0x8c7   :  { %v1951_v38 = vpop.f32.mrf.mxu1 }
 0x8c8   :  { %2715 = vmatmul.msk.f32.vlgmr.msrb.gmra.mxu1 %vm1014_vm10, %v1951_v38 }
 0x8cb   :  { %v1913_v19 = vpop.f32.mrf.mxu0 }
 0x8cc   :  { %2713 = vmatmul.msk.f32.gmra.mxu0 %vm1014_vm10, %v1913_v19 }
 0x8cf   :  { %v1954_v28 = vpop.f32.mrf.mxu1 }
 0x8d0   :  { %2716 = vmatmul.msk.f32.gmra.mxu1 %vm1014_vm10, %v1954_v28 }
 0x8d3   :  { %v2066_v26 = vpop.f32.mrf.mxu0  ;;  %v2133_v30 = vpop.f32.mrf.mxu2 }
 0x8d4   :  { %v2296_v15 = vsel %vm67_vm0, %v2066_v26, 0.0  ;;  %v2314_v51 = vsel %vm67_vm0, %v2133_v30, 0.0 }
 0x8d7   :  { %v2098_v3 = vpop.f32.mrf.mxu1 }
 0x8d8   :  { %v2297_v54 = vsel %vm67_vm0, %v2098_v3, 0.0  ;;  %v2416_v3 = vld [vmem:[%s4208_s11 + $0x18] sm:$0xff] }
 0x8d9   :  { %v2298_v2 = vadd.f32 %v2297_v54, %v2296_v15  ;;  %2439 = vmatpush.msra.mxu0 %v2416_v3  ;;  %v2413_v54 = vld [vmem:[%s4208_s11] sm:$0xff] }
 0x8db   :  { %v2069_v13 = vpop.f32.mrf.mxu0  ;;  %v2300_v56 = vadd.f32 %v2299_v33, %v2298_v2  ;;  %2440 = vmatpush.msra.mxu0 %v2415_v8 }
 0x8dc   :  { %v2311_v12 = vsel %vm67_vm0, %v2069_v13, 0.0 }
 0x8e0   :  { %v2101_v16 = vpop.f32.mrf.mxu1 }
 0x8e1   :  { %v2312_v0 = vsel %vm67_vm0, %v2101_v16, 0.0 }
 0x8e2   :  { %v2313_v17 = vadd.f32 %v2312_v0, %v2311_v12 }
 0x8e4   :  { %v2162_v25 = vpop.f32.mrf.mxu3  ;;  %v2315_v14 = vadd.f32 %v2314_v51, %v2313_v17 }
 0x8e5   :  { %v2301_v48 = vsel %vm67_vm0, %v2162_v25, 0.0  ;;  %v2414_v25 = vld [vmem:[%s4208_s11 + $0x8] sm:$0xff] }
 0x8e6   :  { %v2302_v20 = vadd.f32 %v2301_v48, %v2300_v56  ;;  %2441 = vmatpush.msra.mxu0 %v2414_v25 }
 0x8e8   :  { %2442 = vmatpush.msra.mxu0 %v2413_v54  ;;  %v2453_v54 = vld [vmem:[%s4210_s13 + $0x8] sm:$0xff] }
 0x8ed   :  { %v2258_v61 = vpop.f32.mrf.mxu2 }
 0x8ee   :  { %v2307_v29 = vsel %vm67_vm0, %v2258_v61, 0.0 }
 0x8f5   :  { %v2165_v22 = vpop.f32.mrf.mxu3 }
 0x8f6   :  { %v2316_v6 = vsel %vm67_vm0, %v2165_v22, 0.0 }
 0x8f7   :  { %v2317_v63 = vadd.f32 %v2316_v6, %v2315_v14  ;;  %v2456_v14 = vld [vmem:[%s4210_s13 + $0x20] sm:$0xff] }
 0x90c   :  { %v2290_v31 = vpop.f32.mrf.mxu3 }
 0x90d   :  { %v2309_v49 = vsel %vm67_vm0, %v2290_v31, 0.0  ;;  %v2458_v31 = vld [vmem:[%s4210_s13 + $0x30] sm:$0xff] }
 0x935   :  { %v2261_v58 = vpop.f32.mrf.mxu2 }
 0x936   :  { %v2322_v37 = vsel %vm67_vm0, %v2261_v58, 0.0 }
 0x941   :  { %v2194_v62 = vpop.f32.mrf.mxu0 }
 0x942   :  { %v2303_v5 = vsel %vm67_vm0, %v2194_v62, 0.0 }
 0x943   :  { %v2304_v11 = vadd.f32 %v2303_v5, %v2302_v20 }
 0x945   :  { %v2226_v27 = vpop.f32.mrf.mxu1  ;;  %v2293_v39 = vpop.f32.mrf.mxu3 }
 0x946   :  { %v2305_v42 = vsel %vm67_vm0, %v2226_v27, 0.0  ;;  %v2324_v9 = vsel %vm67_vm0, %v2293_v39, 0.0 }
 0x947   :  { %v2306_v60 = vadd.f32 %v2305_v42, %v2304_v11  ;;  %v2459_v42 = vld [vmem:[%s4210_s13 + $0x38] sm:$0xff] }
 0x948   :  { %2476 = vmatpush.msra.mxu1 %v2459_v42 }
 0x949   :  { %v2308_v24 = vadd.f32 %v2307_v29, %v2306_v60  ;;  %v2197_v34 = vpop.f32.mrf.mxu0  ;;  %v2457_v29 = vld [vmem:[%s4210_s13 + $0x28] sm:$0xff] }
 0x94a   :  { %v2318_v52 = vsel %vm67_vm0, %v2197_v34, 0.0  ;;  %2477 = vmatpush.msra.mxu1 %v2458_v31 }
 0x94b   :  { %v2310_v35 = vadd.f32 %v2309_v49, %v2308_v24  ;;  %v2319_v59 = vadd.f32 %v2318_v52, %v2317_v63 }
 0x94c   :  { %2478 = vmatpush.msra.mxu1 %v2457_v29 }
 0x94d   :  { %v2229_v23 = vpop.f32.mrf.mxu1  ;;  %v2327_v55 = vadd.f32 %v2326_v53, %v2310_v35 }
 0x94e   :  { %v2320_v4 = vsel %vm67_vm0, %v2229_v23, 0.0  ;;  %2479 = vmatpush.msra.mxu1 %v2456_v14  ;;  %v4158_v23 = vld [vmem:[%s4211_s14] sm:$0xff] }
 0x94f   :  { %v2321_v44 = vadd.f32 %v2320_v4, %v2319_v59  ;;  %v2329_v7 = vadd.f32 %v2327_v55, %v3591_v10  ;;  %v2375_v55 = vperm.slane %v4158_v23, 2 }
 0x951   :  { %v2323_v45 = vadd.f32 %v2322_v37, %v2321_v44  ;;  %v2331_v18 = vsel %vm67_vm0, %v2329_v7, 0.0 }
 0x952   :  { %2332 = vadd.xlane.f32.xlu1 %v2331_v18 }
 0x953   :  { %v2325_v47 = vadd.f32 %v2324_v9, %v2323_v45 }
 0x955   :  { %v2328_v32 = vadd.f32 %v2326_v53, %v2325_v47  ;;  %v2455_v53 = vld [vmem:[%s4210_s13 + $0x18] sm:$0xff]  ;;  %v2410_v47 = vperm.slane %v4158_v23, 3 }
 0x956   :  { %2480 = vmatpush.msra.mxu1 %v2455_v53 }
 0x957   :  { %v2330_v46 = vadd.f32 %v2328_v32, %v3608_v1 }
 0x959   :  { %v2334_v50 = vsel %vm67_vm0, %v2330_v46, 0.0 }
 0x95a   :  { %2335 = vadd.xlane.f32.xlu2 %v2334_v50 }
 0x9c5   :  { %v2333_v21 = vpop.xlane.xlu1 %2332 }
 0x9c6   :  { %v2337_v41 = vmul.f32 %v2333_v21, %v3459_v43 }
 0x9c8   :  { %v4117_v40 = vsub.f32 %v2329_v7, %v2337_v41 }
 0x9ca   :  { %v2341_v10 = vmul.f32 %v4117_v40, %v4117_v40  ;;  %v2376_v45 = vmul.f32 %v2375_v55, %v4117_v40 }
 0x9cc   :  { %v2343_v57 = vsel %vm67_vm0, %v2341_v10, 0.0 }
 0x9cd   :  { %2344 = vadd.xlane.f32.xlu0 %v2343_v57  ;;  %v2336_v38 = vpop.xlane.xlu2 %2335 }
 0x9ce   :  { %v2338_v19 = vmul.f32 %v2336_v38, %v3459_v43 }
 0x9d0   :  { %v4123_v28 = vsub.f32 %v2330_v46, %v2338_v19 }
 0x9d2   :  { %v2342_v1 = vmul.f32 %v4123_v28, %v4123_v28 }
 0x9d4   :  { %v2346_v26 = vsel %vm67_vm0, %v2342_v1, 0.0  ;;  %v2377_v1 = vmul.f32 %v2375_v55, %v4123_v28  ;;  %v2452_v28 = vld [vmem:[%s4210_s13] sm:$0xff] }
 0x9d5   :  { %2347 = vadd.xlane.f32.xlu2 %v2346_v26 }
 0xa40   :  { %v2345_v13 = vpop.xlane.xlu0 %2344 }
 0xa41   :  { %v2349_v15 = vmul.f32 0.032258064, %v2345_v13  ;;  %v2454_v13 = vld [vmem:[%s4210_s13 + $0x10] sm:$0xff] }
 0xa42   :  { %2481 = vmatpush.msra.mxu1 %v2454_v13 }
 0xa43   :  { %2955 = vrsqrt.f32 %v2349_v15  ;;  %vm2358_vm10 = vcmp.eq.f32.partialorder %v2349_v15, inf  ;;  %v2361_v17 = vand.u32 2147483648, %v2349_v15  ;;  %vm2360_vm6 = vcmp.eq.f32.partialorder %v2349_v15, 0.0 }
 0xa44   :  { %2482 = vmatpush.msra.mxu1 %v2453_v54 }
 0xa46   :  { %2483 = vmatpush.msra.mxu1 %v2452_v28 }
 0xa48   :  { %v2348_v30 = vpop.xlane.xlu2 %2347 }
 0xa49   :  { %v2956_v2 = vpop.eup %2955  ;;  %v2350_v16 = vmul.f32 0.032258064, %v2348_v30 }
 0xa4a   :  { %v2352_v22 = vmul.f32 %v2956_v2, %v2349_v15 }
 0xa4b   :  { %2957 = vrsqrt.f32 %v2350_v16  ;;  %vm2370_vm5 = vcmp.eq.f32.partialorder %v2350_v16, inf  ;;  %v2373_v34 = vand.u32 2147483648, %v2350_v16  ;;  %vm2372_vm4 = vcmp.eq.f32.partialorder %v2350_v16, 0.0 }
 0xa4c   :  { %v2353_v33 = vmul.f32 %v2956_v2, %v2352_v22 }
 0xa4e   :  { %v2354_v48 = vmul.f32 0.5, %v2353_v33 }
 0xa50   :  { %v2355_v56 = vsub.f32 1.5, %v2354_v48 }
 0xa51   :  { %v2958_v62 = vpop.eup %2957 }
 0xa52   :  { %v2356_v0 = vmul.f32 %v2956_v2, %v2355_v56  ;;  %v2364_v5 = vmul.f32 %v2958_v62, %v2350_v16  ;;  %v2460_v56 = vperm.slane %v4101_v36, 1 }
 0xa54   :  { %v2357_v20 = vmul.f32 %v2356_v0, %v2349_v15  ;;  %v2365_v12 = vmul.f32 %v2958_v62, %v2364_v5 }
 0xa56   :  { %v2359_v61 = vsel %vm2358_vm10, %v2349_v15, %v2357_v20  ;;  %v2366_v11 = vmul.f32 0.5, %v2365_v12  ;;  %v2848_v15 = vld [vmem:[%s4209_s12] ss:$0 sm:$0xff]  ;;  %s3008_s12 = smov [#allocation2]  }
 0xa57   :  { %v2362_v27 = vsel %vm2360_vm6, %v2361_v17, %v2359_v61  ;;  %s2581_s13 = sshll.u32 %s3008_s12, 4  ;;  %s2582_s13 = int_to_ptr.vmem [resolvable:$true] %s2581_s13 }
 0xa58   :  { %v2378_v60 = vadd.f32 1e-06, %v2362_v27  ;;  %v2367_v51 = vsub.f32 1.5, %v2366_v11 }
 0xa5a   :  { %2959 = vrcp.f32 %v2378_v60  ;;  %v2368_v6 = vmul.f32 %v2958_v62, %v2367_v51  ;;  %v2391_v4 = vand.u32 2147483648, %v2378_v60  ;;  %v2389_v44 = vand.u32 2147483647, %v2378_v60 }
 0xa5b   :  { %vm2385_vm8 = vweird.f32 %v2378_v60 }
 0xa5c   :  { %v2369_v24 = vmul.f32 %v2368_v6, %v2350_v16  ;;  %v2392_v18 = vor.u32 1.1754944e-38, %v2391_v4  ;;  %vm2390_vm2 = vcmp.eq.f32.partialorder %v2389_v44, 8.507059e+37 }
 0xa5e   :  { %v2371_v49 = vsel %vm2370_vm5, %v2350_v16, %v2369_v24 }
 0xa5f   :  { %v2374_v52 = vsel %vm2372_vm4, %v2373_v34, %v2371_v49 }
 0xa60   :  { %v2960_v63 = vpop.eup %2959  ;;  %v2379_v35 = vadd.f32 1e-06, %v2374_v52 }
 0xa61   :  { %v2381_v58 = vmul.f32 %v2960_v63, %v2378_v60  ;;  %vm2386_vm7 = vweird.f32 %v2960_v63 }
 0xa62   :  { %2961 = vrcp.f32 %v2379_v35  ;;  %vm2387_vm1 = vmor %vm2385_vm8, %vm2386_vm7  ;;  %v2406_v41 = vand.u32 2147483648, %v2379_v35  ;;  %v2404_v38 = vand.u32 2147483647, %v2379_v35  ;;  %vm2400_vm11 = vweird.f32 %v2379_v35 }
 0xa63   :  { %v2382_v59 = vsub.f32 1.0, %v2381_v58 }
 0xa64   :  { %v2407_v40 = vor.u32 1.1754944e-38, %v2406_v41  ;;  %vm2405_vm13 = vcmp.eq.f32.partialorder %v2404_v38, 8.507059e+37 }
 0xa65   :  { %v2383_v39 = vmul.f32 %v2960_v63, %v2382_v59 }
 0xa67   :  { %v2384_v7 = vadd.f32 %v2960_v63, %v2383_v39 }
 0xa68   :  { %v2962_v37 = vpop.eup %2961 }
 0xa69   :  { %v2388_v9 = vsel %vm2387_vm1, %v2960_v63, %v2384_v7  ;;  %v2396_v32 = vmul.f32 %v2962_v37, %v2379_v35  ;;  %vm2401_vm9 = vweird.f32 %v2962_v37 }
 0xa6a   :  { %v2393_v46 = vsel %vm2390_vm2, %v2392_v18, %v2388_v9  ;;  %vm2402_vm12 = vmor %vm2400_vm11, %vm2401_vm9 }
 0xa6b   :  { %v2394_v50 = vmul.f32 %v2393_v46, %v2376_v45  ;;  %v2397_v21 = vsub.f32 1.0, %v2396_v32 }
 0xa6d   :  { %v2411_v10 = vadd.f32 %v2410_v47, %v2394_v50  ;;  %v2398_v57 = vmul.f32 %v2962_v37, %v2397_v21 }
 0xa6f   :  { %2723 = vmatmul.msk.f32.vlgmr.msra.gmra.mxu0 %vm67_vm0, %v2411_v10  ;;  %v2399_v19 = vadd.f32 %v2962_v37, %v2398_v57 }
 0xa71   :  { %v2403_v26 = vsel %vm2402_vm12, %v2962_v37, %v2399_v19 }
 0xa72   :  { %v2408_v3 = vsel %vm2405_vm13, %v2407_v40, %v2403_v26 }
 0xa73   :  { %v2409_v8 = vmul.f32 %v2408_v3, %v2377_v1  ;;  %v2537_v1 = vperm.slane %v4158_v23, 4 }
 0xa75   :  { %v2412_v25 = vadd.f32 %v2410_v47, %v2409_v8 }
 0xa77   :  { %2724 = vmatmul.msk.f32.gmra.mxu0 %vm67_vm0, %v2412_v25 }
 0xaec   :  { %v2444_v30 = vpop.f32.mrf.mxu0 }
 0xaed   :  { %v2445_v2 = vadd.f32 %v2848_v15, %v2444_v30 }
 0xaef   :  { %v2450_v16 = vmax.f32 %v2445_v2, 0.0  ;;  %v2572_v2 = vperm.slane %v4158_v23, 5 }
 0xaf1   :  { %2725 = vmatmul.msk.f32.vlgmr.msra.gmra.mxu1 %vm2461_vm14, %v2450_v16 }
 0xaf4   :  { %v2447_v22 = vpop.f32.mrf.mxu0 }
 0xaf5   :  { %v2448_v33 = vadd.f32 %v2848_v15, %v2447_v22 }
 0xaf7   :  { %v2451_v48 = vmax.f32 %v2448_v33, 0.0 }
 0xaf9   :  { %2726 = vmatmul.msk.f32.gmra.mxu1 %vm2461_vm14, %v2451_v48 }
 0xb6e   :  { %v2485_v62 = vpop.f32.mrf.mxu1 }
 0xb6f   :  { %v2486_v0 = vadd.f32 %v2485_v62, %v2460_v56 }
 0xb71   :  { %v2491_v5 = vadd.f32 %v2486_v0, %v2411_v10 }
 0xb73   :  { %v2493_v20 = vsel %vm67_vm0, %v2491_v5, 0.0 }
 0xb74   :  { %2494 = vadd.xlane.f32.xlu1 %v2493_v20 }
 0xb76   :  { %v2488_v12 = vpop.f32.mrf.mxu1 }
 0xb77   :  { %v2489_v17 = vadd.f32 %v2488_v12, %v2460_v56 }
 0xb79   :  { %v2492_v61 = vadd.f32 %v2489_v17, %v2412_v25 }
 0xb7b   :  { %v2496_v11 = vsel %vm67_vm0, %v2492_v61, 0.0 }
 0xb7c   :  { %2497 = vadd.xlane.f32.xlu2 %v2496_v11 }
 0xbe7   :  { %v2495_v27 = vpop.xlane.xlu1 %2494 }
 0xbe8   :  { %v2499_v42 = vmul.f32 %v2495_v27, %v3459_v43 }
 0xbea   :  { %v2501_v31 = vsub.f32 %v2491_v5, %v2499_v42 }
 0xbec   :  { %v2503_v60 = vmul.f32 %v2501_v31, %v2501_v31  ;;  %v2538_v54 = vmul.f32 %v2537_v1, %v2501_v31 }
 0xbee   :  { %v2505_v51 = vsel %vm67_vm0, %v2503_v60, 0.0 }
 0xbef   :  { %2506 = vadd.xlane.f32.xlu1 %v2505_v51  ;;  %v2498_v36 = vpop.xlane.xlu2 %2497 }
 0xbf0   :  { %v2500_v29 = vmul.f32 %v2498_v36, %v3459_v43 }
 0xbf2   :  { %v4184_v6 = vsub.f32 %v2492_v61, %v2500_v29 }
 0xbf4   :  { %v2504_v14 = vmul.f32 %v4184_v6, %v4184_v6  ;;  %v2539_v12 = vmul.f32 %v2537_v1, %v4184_v6 }
 0xbf6   :  { %v2508_v24 = vsel %vm67_vm0, %v2504_v14, 0.0 }
 0xbf7   :  { %2509 = vadd.xlane.f32.xlu0 %v2508_v24 }
 0xc62   :  { %v2507_v34 = vpop.xlane.xlu1 %2506 }
 0xc63   :  { %v2511_v53 = vmul.f32 0.032258064, %v2507_v34 }
 0xc65   :  { %2963 = vrsqrt.f32 %v2511_v53  ;;  %vm2520_vm15 = vcmp.eq.f32.partialorder %v2511_v53, inf  ;;  %v2523_v37 = vand.u32 2147483648, %v2511_v53  ;;  %vm2522_vm3 = vcmp.eq.f32.partialorder %v2511_v53, 0.0 }
 0xc6a   :  { %v2510_v49 = vpop.xlane.xlu0 %2509 }
 0xc6b   :  { %v2964_v52 = vpop.eup %2963  ;;  %v2512_v63 = vmul.f32 0.032258064, %v2510_v49 }
 0xc6c   :  { %v2514_v35 = vmul.f32 %v2964_v52, %v2511_v53 }
 0xc6d   :  { %2965 = vrsqrt.f32 %v2512_v63  ;;  %vm2532_vm10 = vcmp.eq.f32.partialorder %v2512_v63, inf  ;;  %v2535_v21 = vand.u32 2147483648, %v2512_v63  ;;  %vm2534_vm6 = vcmp.eq.f32.partialorder %v2512_v63, 0.0 }
 0xc6e   :  { %v2515_v58 = vmul.f32 %v2964_v52, %v2514_v35 }
 0xc70   :  { %v2516_v59 = vmul.f32 0.5, %v2515_v58 }
 0xc72   :  { %v2517_v55 = vsub.f32 1.5, %v2516_v59 }
 0xc73   :  { %v2966_v43 = vpop.eup %2965 }
 0xc74   :  { %v2518_v4 = vmul.f32 %v2964_v52, %v2517_v55  ;;  %v2526_v39 = vmul.f32 %v2966_v43, %v2512_v63 }
 0xc76   :  { %v2519_v44 = vmul.f32 %v2518_v4, %v2511_v53  ;;  %v2527_v7 = vmul.f32 %v2966_v43, %v2526_v39 }
 0xc78   :  { %v2521_v45 = vsel %vm2520_vm15, %v2511_v53, %v2519_v44  ;;  %v2528_v18 = vmul.f32 0.5, %v2527_v7 }
 0xc79   :  { %v2524_v9 = vsel %vm2522_vm3, %v2523_v37, %v2521_v45 }
 0xc7a   :  { %v2540_v47 = vadd.f32 1e-06, %v2524_v9  ;;  %v2529_v32 = vsub.f32 1.5, %v2528_v18 }
 0xc7c   :  { %2967 = vrcp.f32 %v2540_v47  ;;  %v2530_v46 = vmul.f32 %v2966_v43, %v2529_v32  ;;  %v2553_v26 = vand.u32 2147483648, %v2540_v47  ;;  %v2551_v8 = vand.u32 2147483647, %v2540_v47 }
 0xc7d   :  { %vm2547_vm4 = vweird.f32 %v2540_v47 }
 0xc7e   :  { %v2531_v50 = vmul.f32 %v2530_v46, %v2512_v63  ;;  %v2554_v28 = vor.u32 1.1754944e-38, %v2553_v26  ;;  %vm2552_vm8 = vcmp.eq.f32.partialorder %v2551_v8, 8.507059e+37 }
 0xc80   :  { %v2533_v41 = vsel %vm2532_vm10, %v2512_v63, %v2531_v50 }
 0xc81   :  { %v2536_v10 = vsel %vm2534_vm6, %v2535_v21, %v2533_v41 }
 0xc82   :  { %v2968_v57 = vpop.eup %2967  ;;  %v2541_v38 = vadd.f32 1e-06, %v2536_v10 }
 0xc83   :  { %v2543_v19 = vmul.f32 %v2968_v57, %v2540_v47  ;;  %vm2548_vm5 = vweird.f32 %v2968_v57 }
 0xc84   :  { %2969 = vrcp.f32 %v2541_v38  ;;  %vm2549_vm7 = vmor %vm2547_vm4, %vm2548_vm5  ;;  %v2568_v48 = vand.u32 2147483648, %v2541_v38  ;;  %v2566_v62 = vand.u32 2147483647, %v2541_v38  ;;  %vm2562_vm2 = vweird.f32 %v2541_v38 }
 0xc85   :  { %v2544_v40 = vsub.f32 1.0, %v2543_v19 }
 0xc86   :  { %v2569_v20 = vor.u32 1.1754944e-38, %v2568_v48  ;;  %vm2567_vm11 = vcmp.eq.f32.partialorder %v2566_v62, 8.507059e+37 }
 0xc87   :  { %v2545_v3 = vmul.f32 %v2968_v57, %v2544_v40 }
 0xc89   :  { %v2546_v25 = vadd.f32 %v2968_v57, %v2545_v3 }
 0xc8a   :  { %v2970_v13 = vpop.eup %2969 }
 0xc8b   :  { %v2550_v15 = vsel %vm2549_vm7, %v2968_v57, %v2546_v25  ;;  %v2558_v30 = vmul.f32 %v2970_v13, %v2541_v38  ;;  %vm2563_vm1 = vweird.f32 %v2970_v13 }
 0xc8c   :  { %v2555_v16 = vsel %vm2552_vm8, %v2554_v28, %v2550_v15  ;;  %vm2564_vm9 = vmor %vm2562_vm2, %vm2563_vm1 }
 0xc8d   :  { %v2556_v22 = vmul.f32 %v2555_v16, %v2538_v54  ;;  %v2559_v33 = vsub.f32 1.0, %v2558_v30 }
 0xc8f   :  { %v2560_v56 = vmul.f32 %v2970_v13, %v2559_v33  ;;  %v2573_v0 = vadd.f32 %v2572_v2, %v2556_v22 }
 0xc91   :  { %v2561_v5 = vadd.f32 %v2970_v13, %v2560_v56  ;;  %2575 = vst.msk [vmem:[#allocation2] sm:$0xff] %vm67_vm0, %v2573_v0 }
 0xc93   :  { %v2565_v17 = vsel %vm2564_vm9, %v2970_v13, %v2561_v5 }
 0xc94   :  { %v2570_v23 = vsel %vm2567_vm11, %v2569_v20, %v2565_v17 }
 0xc95   :  { %v2571_v61 = vmul.f32 %v2570_v23, %v2539_v12 }
 0xc97   :  { %v2574_v11 = vadd.f32 %v2572_v2, %v2571_v61 }
 0xc99   :  { %2576 = vst.msk [vmem:[#allocation2 + $0x8] sm:$0xff] %vm67_vm0, %v2574_v11 }
 0xc9a   :  { %2589 = dma.vmem_to_hbm [thread:$0]  %s2582_s13, 256, %s2584_s25, [#allocation3], %s3009_s8, %s3009_s8, %s3010_s7  }
 0xc9b   :  { %2996 = dma.done.wait [#allocation3], 256  }
 0xc9c   :  { %2997 = vsyncadd [#allocation3], 4294967040 }
 0xc9d   :  { %2594 = vsyncpa [#allocation3], 1 }

</bundles_post_ra>
